<compile_context>
chip_gen: v7x
topology: tpu7x:2x2x1
jax: 0.10.0
libtpu: 0.0.40
codegen_flags: <defaults>
</compile_context>

<pallas_src>
import functools

import numpy as np
import jax
import jax.numpy as jnp
from jax.experimental import pallas as pl
from jax.experimental.pallas import tpu as pltpu


def _round_up(x, m):
    return (x + m - 1) // m * m


# ----------------------- sorted-edge fused GAT kernel -------------------------

def _gat_sorted_kernel(wn_ref, wb_ref, wf_ref,            # scalar prefetch (SMEM)
                       src_ref, edge_h_ref, w_ref, ext_ref, sel_ref,
                       o_ref, acc_ref, *, alpha, hd, nheads, tile_n):
    t = pl.program_id(0)
    flags = wf_ref[t]
    is_first = (flags & 1) != 0       # first work item of this node tile
    is_last = (flags & 2) != 0        # last work item of this node tile
    is_valid = (flags & 4) != 0       # item carries real edges

    @pl.when(is_first)
    def _():
        acc_ref[...] = jnp.zeros_like(acc_ref)

    @pl.when(is_valid)
    def _():
        edge_h = edge_h_ref[...]                                    # (tE, Fp) bf16
        # one fused MXU pass: cols [0:hd] = per-head edge_m, [hd:hd+H] = 1
        # (rowsum trick from the ones column), [hd+H:hd+2H] = attention score.
        mm = jnp.dot(edge_h, w_ref[...], preferred_element_type=jnp.float32)
        score = mm[:, hd + nheads:hd + 2 * nheads]                  # (tE, H)
        lrelu = jnp.where(score > 0, score, alpha * score)          # LeakyReLU
        edge_e = jnp.exp(-lrelu)                                    # (tE, H)
        # broadcast each head's e over its D columns + its rowsum column
        e_ext = jnp.dot(edge_e, ext_ref[...],
                        preferred_element_type=jnp.float32)         # (tE, Wp)
        payload = (e_ext * mm).astype(jnp.bfloat16)                 # [e*m | e | 0]

        # scatter-add over source nodes: one-hot built in-register
        tile_e = edge_h.shape[0]
        node_ids = (wn_ref[t] * tile_n
                    + jax.lax.broadcasted_iota(jnp.int32, (tile_n, tile_e), 0))
        onehot = (node_ids == src_ref[...]).astype(jnp.bfloat16)    # (tN, tE)
        acc_ref[...] += jnp.dot(onehot, payload,
                                preferred_element_type=jnp.float32)

    @pl.when(is_last)
    def _():
        acc = acc_ref[...]
        col = jax.lax.broadcasted_iota(jnp.int32, acc.shape, 1)
        num = jnp.where(col < hd, acc, 0.0)
        # per-head rowsum broadcast back over its D columns (constant SEL matrix)
        den = jnp.dot(acc, sel_ref[...], preferred_element_type=jnp.float32)
        den = jnp.where(den == 0.0, 1e-12, den)
        h = num * pl.reciprocal(den, approx=True)
        o_ref[...] = jnp.where(h > 0, h, jnp.exp(h) - 1.0)          # ELU


def sp_gat_multihead(x, edge, edge_embed, a_list, a2_list, num_nodes, alpha,
                     *, tile_n=256, tile_e=2048):
    """All heads of one SpGAT attention stage in a single pallas_call.

    Returns (num_nodes, nheads * D) == the concat over heads the torch code does.
    """
    nheads = len(a_list)
    d = a_list[0].shape[0]
    f = a_list[0].shape[1]
    hd = nheads * d
    f1 = f + 1
    f_pad = _round_up(f1, 128)
    acc_w = _round_up(hd + 2 * nheads, 128)

    src = edge[0].astype(jnp.int32)
    dst = edge[1].astype(jnp.int32)
    e = src.shape[0]

    # ---- sort edges by source node (outside the kernel; cheap XLA sort) -----
    order = jnp.argsort(src)
    src_s = src[order]
    dst_s = dst[order]

    # ---- edge features built directly in bf16, lane-padded to 128 -----------
    x_b = x.astype(jnp.bfloat16)
    ee_b = edge_embed[order].astype(jnp.bfloat16)
    edge_h = jnp.concatenate(
        [x_b[src_s], x_b[dst_s], ee_b,
         jnp.ones((e, 1), jnp.bfloat16),                 # ones col -> rowsum
         jnp.zeros((e, f_pad - f1), jnp.bfloat16)], axis=1)        # (E, Fp)

    tile_n = max(8, min(tile_n, _round_up(num_nodes, 8)))
    tile_e = max(128, min(tile_e, _round_up(e, 128)))
    n_pad = _round_up(num_nodes, tile_n)
    e_pad = _round_up(e, tile_e)
    n_tiles = n_pad // tile_n
    e_blocks = e_pad // tile_e

    edge_h = jnp.pad(edge_h, ((0, e_pad - e), (0, 0)))
    src_row = jnp.pad(src_s, (0, e_pad - e),
                      constant_values=-1).reshape(1, e_pad)

    # ---- fused constant matrices (tiny, built once per call) ----------------
    a_all = jnp.concatenate([a.T for a in a_list], axis=1)           # (F, HD)
    sw = jnp.stack([a_list[h].T @ a2_list[h].reshape(-1)
                    for h in range(nheads)], axis=1)                 # (F, H)
    w_fused = jnp.zeros((f_pad, acc_w), jnp.float32)
    w_fused = w_fused.at[:f, :hd].set(a_all)
    w_fused = w_fused.at[f, hd:hd + nheads].set(1.0)                 # rowsum ones
    w_fused = w_fused.at[:f, hd + nheads:hd + 2 * nheads].set(sw)    # scores
    w_fused = w_fused.astype(jnp.bfloat16)
    ext = jnp.zeros((nheads, acc_w), jnp.float32)
    sel = jnp.zeros((acc_w, acc_w), jnp.float32)
    for h in range(nheads):
        ext = ext.at[h, h * d:(h + 1) * d].set(1.0)
        ext = ext.at[h, hd + h].set(1.0)
        sel = sel.at[hd + h, h * d:(h + 1) * d].set(1.0)

    # ---- work items: (node_tile, edge_block) pairs over sorted edges --------
    w_items = e_blocks + n_tiles                     # static upper bound
    starts = jnp.arange(n_tiles, dtype=jnp.int32) * tile_n
    lo = jnp.searchsorted(src_s, starts, side='left').astype(jnp.int32)
    hi = jnp.searchsorted(src_s, starts + tile_n, side='left').astype(jnp.int32)
    nonempty = hi > lo
    first_blk = jnp.where(nonempty, lo // tile_e, 0).astype(jnp.int32)
    last_blk = jnp.where(nonempty, (hi - 1) // tile_e, 0).astype(jnp.int32)
    counts = jnp.where(nonempty, last_blk - first_blk + 1, 1).astype(jnp.int32)
    ends = jnp.cumsum(counts).astype(jnp.int32)
    offs = ends - counts
    total = ends[-1]

    t_idx = jnp.arange(w_items, dtype=jnp.int32)
    node_t = jnp.minimum(
        jnp.searchsorted(ends, t_idx, side='right').astype(jnp.int32),
        n_tiles - 1)
    local = t_idx - offs[node_t]
    block_t = (first_blk[node_t]
               + jnp.minimum(local, counts[node_t] - 1)).astype(jnp.int32)
    in_range = t_idx < total
    first_t = in_range & (local == 0)
    last_t = in_range & (local == counts[node_t] - 1)
    valid_t = in_range & nonempty[node_t]
    flags_t = (first_t.astype(jnp.int32) + 2 * last_t.astype(jnp.int32)
               + 4 * valid_t.astype(jnp.int32))

    kernel = functools.partial(_gat_sorted_kernel, alpha=alpha, hd=hd,
                               nheads=nheads, tile_n=tile_n)
    out = pl.pallas_call(
        kernel,
        out_shape=jax.ShapeDtypeStruct((n_pad, acc_w), jnp.float32),
        grid_spec=pltpu.PrefetchScalarGridSpec(
            num_scalar_prefetch=3,
            grid=(w_items,),
            in_specs=[
                pl.BlockSpec((1, tile_e), lambda t, wn, wb, wf: (0, wb[t])),
                pl.BlockSpec((tile_e, f_pad), lambda t, wn, wb, wf: (wb[t], 0)),
                pl.BlockSpec((f_pad, acc_w), lambda t, wn, wb, wf: (0, 0)),
                pl.BlockSpec((nheads, acc_w), lambda t, wn, wb, wf: (0, 0)),
                pl.BlockSpec((acc_w, acc_w), lambda t, wn, wb, wf: (0, 0)),
            ],
            out_specs=pl.BlockSpec((tile_n, acc_w),
                                   lambda t, wn, wb, wf: (wn[t], 0)),
            scratch_shapes=[pltpu.VMEM((tile_n, acc_w), jnp.float32)],
        ),
        compiler_params=pltpu.CompilerParams(
            dimension_semantics=("arbitrary",),
            vmem_limit_bytes=32 * 1024 * 1024),
    )(node_t, block_t, flags_t, src_row, edge_h, w_fused, ext, sel)
    return out[:num_nodes, :hd]


# -------------------- residual upgrade + mask + normalize ---------------------

def _combine_norm_kernel(ent_ref, w_ref, mask_ref, gat_ref, o_ref):
    up = jnp.dot(ent_ref[...], w_ref[...],
                 preferred_element_type=jnp.float32)                 # (tN, HIDp)
    combined = up + mask_ref[...] * gat_ref[...]
    ss = jnp.sum(combined * combined, axis=-1, keepdims=True)
    o_ref[...] = combined * jax.lax.rsqrt(jnp.maximum(ss, 1e-24))


def pallas_combine_normalize(ent_norm, w_entities, mask_col, gat_out,
                             *, tile_n=512):
    n, hid = gat_out.shape
    d_in = ent_norm.shape[1]
    hid_pad = _round_up(hid, 128)
    tile_n = max(8, min(tile_n, _round_up(n, 8)))
    n_pad = _round_up(n, tile_n)
    ent_p = jnp.pad(ent_norm, ((0, n_pad - n), (0, 0)))
    mask_p = jnp.pad(mask_col, ((0, n_pad - n), (0, 0)))
    gat_p = jnp.pad(gat_out, ((0, n_pad - n), (0, hid_pad - hid)))
    w_p = jnp.pad(w_entities, ((0, 0), (0, hid_pad - hid)))
    out = pl.pallas_call(
        _combine_norm_kernel,
        out_shape=jax.ShapeDtypeStruct((n_pad, hid_pad), jnp.float32),
        grid_spec=pltpu.PrefetchScalarGridSpec(
            num_scalar_prefetch=0,
            grid=(n_pad // tile_n,),
            in_specs=[pl.BlockSpec((tile_n, d_in), lambda i: (i, 0)),
                      pl.BlockSpec((d_in, hid_pad), lambda i: (0, 0)),
                      pl.BlockSpec((tile_n, 1), lambda i: (i, 0)),
                      pl.BlockSpec((tile_n, hid_pad), lambda i: (i, 0))],
            out_specs=pl.BlockSpec((tile_n, hid_pad), lambda i: (i, 0))),
        compiler_params=pltpu.CompilerParams(
            dimension_semantics=("parallel",),
            vmem_limit_bytes=32 * 1024 * 1024),
    )(ent_p, w_p, mask_p, gat_p)
    return out[:n, :hid]


# ----------------------------- Model forward ----------------------------------

def spkbgat_forward(params, edge_list, edge_type, batch_inputs,
                    train_indices_nhop, num_nodes, alpha, nheads,
                    *, tile_n=256, tile_e=2048):
    # edge_list_nhop = cat(col3, col0).t() ; edge_type_nhop = cat(col1, col2)
    edge_list_nhop = jnp.stack(
        [train_indices_nhop[:, 3], train_indices_nhop[:, 0]], axis=0)
    edge_type_nhop = jnp.stack(
        [train_indices_nhop[:, 1], train_indices_nhop[:, 2]], axis=1)

    relation_emb = params["relation_embeddings"]
    # entity_embeddings.data = F.normalize(entity_embeddings, p=2, dim=1)
    ent = params["entity_embeddings"]
    entity_norm = ent / jnp.maximum(
        jnp.linalg.norm(ent, axis=1, keepdims=True), 1e-12)   # tiny -> plain XLA

    # ----------------------------- SpGAT --------------------------------------
    edge_full = jnp.concatenate([edge_list, edge_list_nhop], axis=1)
    edge_embed_all = jnp.concatenate(
        [relation_emb[edge_type],
         relation_emb[edge_type_nhop[:, 0]] + relation_emb[edge_type_nhop[:, 1]]],
        axis=0)

    # all heads fused in one pallas_call; output is already the per-head concat
    x = sp_gat_multihead(entity_norm, edge_full, edge_embed_all,
                         list(params["att_a"]), list(params["att_a2"]),
                         num_nodes, alpha, tile_n=tile_n, tile_e=tile_e)
    # dropout_layer: identity (eval)

    # (num_rel, rel_dim) @ (rel_dim, hid): tiny -> plain XLA
    out_relation_1 = jnp.dot(relation_emb, params["W_gat"])
    edge_embed2_all = jnp.concatenate(
        [out_relation_1[edge_type],
         out_relation_1[edge_type_nhop[:, 0]]
         + out_relation_1[edge_type_nhop[:, 1]]], axis=0)

    out_entity_1 = sp_gat_multihead(x, edge_full, edge_embed2_all,
                                    [params["out_a"]], [params["out_a2"]],
                                    num_nodes, alpha,
                                    tile_n=tile_n, tile_e=tile_e)

    # -------------------- mask + residual upgrade + normalize -----------------
    # torch.unique is unnecessary: scatter-set of 1.0 is idempotent
    mask = jnp.zeros((num_nodes, 1), jnp.float32).at[batch_inputs[:, 2], 0].set(1.0)
    out_entity_1 = pallas_combine_normalize(entity_norm, params["W_entities"],
                                            mask, out_entity_1)
    return out_entity_1, out_relation_1


# ------------------------- pure-JAX reference ----------------------------------

def _ref_attention(x, edge, edge_embed, a, a2, num_nodes, alpha):
    src, dst = edge[0], edge[1]
    edge_h = jnp.concatenate([x[src], x[dst], edge_embed], axis=1)
    edge_m = edge_h @ a.T
    score = jnp.sum(edge_m * a2, axis=-1, keepdims=True)
    lrelu = jnp.where(score > 0, score, alpha * score)
    edge_e = jnp.exp(-lrelu)
    edge_w = edge_e * edge_m
    d = a.shape[0]
    h_prime = jnp.zeros((num_nodes, d), jnp.float32).at[src].add(edge_w)
    rowsum = jnp.zeros((num_nodes, 1), jnp.float32).at[src].add(edge_e)
    rowsum = jnp.where(rowsum == 0.0, 1e-12, rowsum)
    h = h_prime / rowsum
    return jnp.where(h > 0, h, jnp.exp(h) - 1.0)


def _ref_forward(params, edge_list, edge_type, batch_inputs,
                 train_indices_nhop, num_nodes, alpha, nheads):
    edge_list_nhop = jnp.stack(
        [train_indices_nhop[:, 3], train_indices_nhop[:, 0]], axis=0)
    edge_type_nhop = jnp.stack(
        [train_indices_nhop[:, 1], train_indices_nhop[:, 2]], axis=1)
    relation_emb = params["relation_embeddings"]
    ent = params["entity_embeddings"]
    ent = ent / jnp.maximum(jnp.linalg.norm(ent, axis=1, keepdims=True), 1e-12)

    edge_full = jnp.concatenate([edge_list, edge_list_nhop], axis=1)
    ee = jnp.concatenate([relation_emb[edge_type],
                          relation_emb[edge_type_nhop[:, 0]]
                          + relation_emb[edge_type_nhop[:, 1]]], axis=0)
    x = jnp.concatenate(
        [_ref_attention(ent, edge_full, ee, params["att_a"][h],
                        params["att_a2"][h], num_nodes, alpha)
         for h in range(nheads)], axis=1)
    out_rel = relation_emb @ params["W_gat"]
    ee2 = jnp.concatenate([out_rel[edge_type],
                           out_rel[edge_type_nhop[:, 0]]
                           + out_rel[edge_type_nhop[:, 1]]], axis=0)
    out_ent = _ref_attention(x, edge_full, ee2, params["out_a"],
                             params["out_a2"], num_nodes, alpha)
    mask = jnp.zeros((num_nodes, 1), jnp.float32).at[batch_inputs[:, 2], 0].set(1.0)
    out_ent = ent @ params["W_entities"] + mask * out_ent
    out_ent = out_ent / jnp.maximum(
        jnp.linalg.norm(out_ent, axis=1, keepdims=True), 1e-12)
    return out_ent, out_rel


# --------------------------------- main -----------------------------------------

def _xavier_uniform(key, shape, gain=1.414):
    fan_out, fan_in = shape
    lim = gain * np.sqrt(6.0 / (fan_in + fan_out))
    return jax.random.uniform(key, shape, jnp.float32, -lim, lim)


if __name__ == "__main__":
    # small shapes consistent with the module (sized so the GAT kernels run a
    # multi-work-item grid: 2 node tiles x 2 edge blocks)
    N, IN_DIM, REL_DIM, NUM_REL = 64, 16, 16, 8
    NHEADS = 2                       # nheads_GAT[0]
    OUT_DIM = IN_DIM                 # SpGAT heads use nfeat for in & out dims
    HID = NHEADS * OUT_DIM           # 32
    E1, E_NHOP, B = 224, 32, 8
    ALPHA = 0.2
    TILE_N, TILE_E = 32, 128

    key = jax.random.PRNGKey(0)
    ks = jax.random.split(key, 16)

    params = {
        "entity_embeddings": jax.random.normal(ks[0], (N, IN_DIM), jnp.float32),
        "relation_embeddings": 0.5 * jax.random.normal(ks[1], (NUM_REL, REL_DIM),
                                                       jnp.float32),
        "att_a": [_xavier_uniform(ks[2 + h], (OUT_DIM, 2 * IN_DIM + REL_DIM))
                  for h in range(NHEADS)],
        "att_a2": [_xavier_uniform(ks[4 + h], (1, OUT_DIM))
                   for h in range(NHEADS)],
        "W_gat": _xavier_uniform(ks[6], (REL_DIM, HID)),
        "out_a": _xavier_uniform(ks[7], (HID, 2 * HID + HID)),
        "out_a2": _xavier_uniform(ks[8], (1, HID)),
        "W_entities": _xavier_uniform(ks[9], (IN_DIM, HID)),
    }

    edge_list = jax.random.randint(ks[10], (2, E1), 0, N, dtype=jnp.int32)
    edge_type = jax.random.randint(ks[11], (E1,), 0, NUM_REL, dtype=jnp.int32)
    train_indices_nhop = jnp.stack(
        [jax.random.randint(ks[12], (E_NHOP,), 0, N, dtype=jnp.int32),
         jax.random.randint(ks[13], (E_NHOP,), 0, NUM_REL, dtype=jnp.int32),
         jax.random.randint(ks[14], (E_NHOP,), 0, NUM_REL, dtype=jnp.int32),
         jax.random.randint(ks[15], (E_NHOP,), 0, N, dtype=jnp.int32)], axis=1)
    batch_inputs = jnp.stack(
        [jax.random.randint(jax.random.PRNGKey(1), (B,), 0, N, dtype=jnp.int32),
         jax.random.randint(jax.random.PRNGKey(2), (B,), 0, NUM_REL, dtype=jnp.int32),
         jax.random.randint(jax.random.PRNGKey(3), (B,), 0, N, dtype=jnp.int32)],
        axis=1)

    out_entity, out_relation = spkbgat_forward(
        params, edge_list, edge_type, batch_inputs, train_indices_nhop,
        N, ALPHA, NHEADS, tile_n=TILE_N, tile_e=TILE_E)
    jax.block_until_ready(out_entity)
    jax.block_until_ready(out_relation)

    ref_entity, ref_relation = _ref_forward(
        params, edge_list, edge_type, batch_inputs, train_indices_nhop,
        N, ALPHA, NHEADS)

    assert out_entity.shape == (N, HID) and out_relation.shape == (NUM_REL, HID)
    assert bool(jnp.all(jnp.isfinite(out_entity)))
    np.testing.assert_allclose(np.asarray(out_entity), np.asarray(ref_entity),
                               atol=5e-2, rtol=5e-2)
    np.testing.assert_allclose(np.asarray(out_relation), np.asarray(ref_relation),
                               atol=5e-2, rtol=5e-2)
    print("KERNEL_OK")
</pallas_src>

<mosaic_0001>
module attributes {stable_mosaic.version = 11 : i64} {
  func.func @_gat_sorted_kernel(%arg0: i32, %arg1: memref<4xi32, #tpu.memory_space<smem>>, %arg2: memref<4xi32, #tpu.memory_space<smem>>, %arg3: memref<4xi32, #tpu.memory_space<smem>>, %arg4: memref<1x128xi32, #tpu.memory_space<vmem>>, %arg5: memref<128x128xbf16, #tpu.memory_space<vmem>>, %arg6: memref<128x128xbf16, #tpu.memory_space<vmem>>, %arg7: memref<2x128xf32, #tpu.memory_space<vmem>>, %arg8: memref<128x128xf32, #tpu.memory_space<vmem>>, %arg9: memref<32x128xf32, #tpu.memory_space<vmem>>, %arg10: memref<32x128xf32, #tpu.memory_space<vmem>>) attributes {dimension_semantics = [#tpu.dimension_semantics<arbitrary>], iteration_bounds = array<i64: 4>, scalar_prefetch = 3 : i64, scratch_operands = 1 : i64, tpu.core_type = #tpu.core_type<tc>, window_params = [{transform_indices = @transform_0, window_bounds = array<i64: 1, 128>}, {transform_indices = @transform_1, window_bounds = array<i64: 128, 128>}, {pipeline_mode = #tpu.pipeline_mode<synchronous>, transform_indices = @transform_2, window_bounds = array<i64: 128, 128>}, {pipeline_mode = #tpu.pipeline_mode<synchronous>, transform_indices = @transform_3, window_bounds = array<i64: 2, 128>}, {pipeline_mode = #tpu.pipeline_mode<synchronous>, transform_indices = @transform_4, window_bounds = array<i64: 128, 128>}, {transform_indices = @transform_5, window_bounds = array<i64: 32, 128>}]} {
    %0 = arith.index_cast %arg0 : i32 to index
    %1 = memref.load %arg3[%0] : memref<4xi32, #tpu.memory_space<smem>>
    %c1_i32 = arith.constant 1 : i32
    %2 = arith.andi %1, %c1_i32 : i32
    %c0_i32 = arith.constant 0 : i32
    %3 = arith.cmpi ne, %2, %c0_i32 : i32
    %c2_i32 = arith.constant 2 : i32
    %4 = arith.andi %1, %c2_i32 : i32
    %c0_i32_0 = arith.constant 0 : i32
    %5 = arith.cmpi ne, %4, %c0_i32_0 : i32
    %c4_i32 = arith.constant 4 : i32
    %6 = arith.andi %1, %c4_i32 : i32
    %c0_i32_1 = arith.constant 0 : i32
    %7 = arith.cmpi ne, %6, %c0_i32_1 : i32
    %8 = arith.extui %3 : i1 to i32
    %c0_i32_2 = arith.constant 0 : i32
    %9 = arith.cmpi ne, %8, %c0_i32_2 : i32
    scf.if %9 {
      %cst = arith.constant 0.000000e+00 : f32
      %14 = vector.broadcast %cst : f32 to vector<32x128xf32>
      %c0 = arith.constant 0 : index
      %c0_5 = arith.constant 0 : index
      %15 = vector.load %arg10[%c0, %c0_5] : memref<32x128xf32, #tpu.memory_space<vmem>>, vector<32x128xf32>
      tpu.vector_store %arg10[%c0, %c0_5], %14 {strides = array<i32>} : memref<32x128xf32, #tpu.memory_space<vmem>>, vector<32x128xf32>,
    } else {
    }
    %10 = arith.extui %7 : i1 to i32
    %c0_i32_3 = arith.constant 0 : i32
    %11 = arith.cmpi ne, %10, %c0_i32_3 : i32
    scf.if %11 {
      %c0 = arith.constant 0 : index
      %c0_5 = arith.constant 0 : index
      %14 = vector.load %arg5[%c0, %c0_5] : memref<128x128xbf16, #tpu.memory_space<vmem>>, vector<128x128xbf16>
      %c0_6 = arith.constant 0 : index
      %c0_7 = arith.constant 0 : index
      %15 = vector.load %arg6[%c0_6, %c0_7] : memref<128x128xbf16, #tpu.memory_space<vmem>>, vector<128x128xbf16>
      %cst = arith.constant dense<0.000000e+00> : vector<128x128xf32>
      %16 = tpu.matmul %14, %15, %cst {dimension_numbers = #tpu.dot_dimension_numbers<[1], [0], [0], [1], [0, 0, 1, 1], [], []>} : vector<128x128xbf16>, vector<128x128xbf16>, vector<128x128xf32> -> vector<128x128xf32>
      %17 = vector.extract_strided_slice %16 {offsets = [0, 34], sizes = [128, 2], strides = [1, 1]} : vector<128x128xf32> to vector<128x2xf32>
      %cst_8 = arith.constant 0.000000e+00 : f32
      %18 = vector.broadcast %cst_8 : f32 to vector<128x2xf32>
      %19 = arith.cmpf ogt, %17, %18 : vector<128x2xf32>
      %cst_9 = arith.constant 2.000000e-01 : f32
      %20 = vector.broadcast %cst_9 : f32 to vector<128x2xf32>
      %21 = arith.mulf %20, %17 : vector<128x2xf32>
      %22 = arith.select %19, %17, %21 : vector<128x2xi1>, vector<128x2xf32>
      %cst_10 = arith.constant 0.000000e+00 : f32
      %23 = vector.broadcast %cst_10 : f32 to vector<128x2xf32>
      %24 = arith.subf %23, %22 : vector<128x2xf32>
      %25 = math.exp %24 : vector<128x2xf32>
      %c0_11 = arith.constant 0 : index
      %c0_12 = arith.constant 0 : index
      %26 = vector.load %arg7[%c0_11, %c0_12] : memref<2x128xf32, #tpu.memory_space<vmem>>, vector<2x128xf32>
      %cst_13 = arith.constant dense<0.000000e+00> : vector<128x128xf32>
      %27 = tpu.matmul %25, %26, %cst_13 {dimension_numbers = #tpu.dot_dimension_numbers<[1], [0], [0], [1], [0, 0, 1, 1], [], []>} : vector<128x2xf32>, vector<2x128xf32>, vector<128x128xf32> -> vector<128x128xf32>
      %28 = arith.mulf %27, %16 : vector<128x128xf32>
      %29 = arith.truncf %28 : vector<128x128xf32> to vector<128x128xbf16>
      %30 = arith.index_cast %arg0 : i32 to index
      %31 = memref.load %arg1[%30] : memref<4xi32, #tpu.memory_space<smem>>
      %c32_i32 = arith.constant 32 : i32
      %32 = arith.muli %31, %c32_i32 : i32
      %33 = tpu.iota {dimensions = array<i32: 0>} : vector<32x128xi32>
      %34 = vector.broadcast %32 : i32 to vector<32x128xi32>
      %35 = arith.addi %34, %33 : vector<32x128xi32>
      %c0_14 = arith.constant 0 : index
      %c0_15 = arith.constant 0 : index
      %36 = vector.load %arg4[%c0_14, %c0_15] : memref<1x128xi32, #tpu.memory_space<vmem>>, vector<1x128xi32>
      %37 = vector.broadcast %36 : vector<1x128xi32> to vector<32x128xi32>
      %38 = arith.cmpi eq, %35, %37 : vector<32x128xi32>
      %39 = arith.extui %38 : vector<32x128xi1> to vector<32x128xi32>
      %40 = arith.sitofp %39 : vector<32x128xi32> to vector<32x128xf32>
      %41 = arith.truncf %40 : vector<32x128xf32> to vector<32x128xbf16>
      %c0_16 = arith.constant 0 : index
      %c0_17 = arith.constant 0 : index
      %42 = vector.load %arg10[%c0_16, %c0_17] : memref<32x128xf32, #tpu.memory_space<vmem>>, vector<32x128xf32>
      %cst_18 = arith.constant dense<0.000000e+00> : vector<32x128xf32>
      %43 = tpu.matmul %41, %29, %cst_18 {dimension_numbers = #tpu.dot_dimension_numbers<[1], [0], [0], [1], [0, 0, 1, 1], [], []>} : vector<32x128xbf16>, vector<128x128xbf16>, vector<32x128xf32> -> vector<32x128xf32>
      %44 = arith.addf %42, %43 : vector<32x128xf32>
      %c0_19 = arith.constant 0 : index
      %c0_20 = arith.constant 0 : index
      %45 = vector.load %arg10[%c0_19, %c0_20] : memref<32x128xf32, #tpu.memory_space<vmem>>, vector<32x128xf32>
      tpu.vector_store %arg10[%c0_19, %c0_20], %44 {strides = array<i32>} : memref<32x128xf32, #tpu.memory_space<vmem>>, vector<32x128xf32>,
    } else {
    }
    %12 = arith.extui %5 : i1 to i32
    %c0_i32_4 = arith.constant 0 : i32
    %13 = arith.cmpi ne, %12, %c0_i32_4 : i32
    scf.if %13 {
      %c0 = arith.constant 0 : index
      %c0_5 = arith.constant 0 : index
      %14 = vector.load %arg10[%c0, %c0_5] : memref<32x128xf32, #tpu.memory_space<vmem>>, vector<32x128xf32>
      %15 = tpu.iota {dimensions = array<i32: 1>} : vector<32x128xi32>
      %c32_i32 = arith.constant 32 : i32
      %16 = vector.broadcast %c32_i32 : i32 to vector<32x128xi32>
      %17 = arith.cmpi slt, %15, %16 : vector<32x128xi32>
      %cst = arith.constant 0.000000e+00 : f32
      %18 = vector.broadcast %cst : f32 to vector<32x128xf32>
      %19 = arith.select %17, %14, %18 : vector<32x128xi1>, vector<32x128xf32>
      %c0_6 = arith.constant 0 : index
      %c0_7 = arith.constant 0 : index
      %20 = vector.load %arg8[%c0_6, %c0_7] : memref<128x128xf32, #tpu.memory_space<vmem>>, vector<128x128xf32>
      %cst_8 = arith.constant dense<0.000000e+00> : vector<32x128xf32>
      %21 = tpu.matmul %14, %20, %cst_8 {dimension_numbers = #tpu.dot_dimension_numbers<[1], [0], [0], [1], [0, 0, 1, 1], [], []>} : vector<32x128xf32>, vector<128x128xf32>, vector<32x128xf32> -> vector<32x128xf32>
      %cst_9 = arith.constant 0.000000e+00 : f32
      %22 = vector.broadcast %cst_9 : f32 to vector<32x128xf32>
      %23 = arith.cmpf oeq, %21, %22 : vector<32x128xf32>
      %cst_10 = arith.constant 9.99999996E-13 : f32
      %24 = vector.broadcast %cst_10 : f32 to vector<32x128xf32>
      %25 = arith.select %23, %24, %21 : vector<32x128xi1>, vector<32x128xf32>
      %26 = tpu.reciprocal %25 {approx = true} : vector<32x128xf32> -> vector<32x128xf32>
      %27 = arith.mulf %19, %26 : vector<32x128xf32>
      %cst_11 = arith.constant 0.000000e+00 : f32
      %28 = vector.broadcast %cst_11 : f32 to vector<32x128xf32>
      %29 = arith.cmpf ogt, %27, %28 : vector<32x128xf32>
      %30 = math.exp %27 : vector<32x128xf32>
      %cst_12 = arith.constant 1.000000e+00 : f32
      %31 = vector.broadcast %cst_12 : f32 to vector<32x128xf32>
      %32 = arith.subf %30, %31 : vector<32x128xf32>
      %33 = arith.select %29, %27, %32 : vector<32x128xi1>, vector<32x128xf32>
      %c0_13 = arith.constant 0 : index
      %c0_14 = arith.constant 0 : index
      %34 = vector.load %arg9[%c0_13, %c0_14] : memref<32x128xf32, #tpu.memory_space<vmem>>, vector<32x128xf32>
      tpu.vector_store %arg9[%c0_13, %c0_14], %33 {strides = array<i32>} : memref<32x128xf32, #tpu.memory_space<vmem>>, vector<32x128xf32>,
    } else {
    }
    return
  }
  func.func @transform_0(%arg0: i32, %arg1: memref<4xi32, #tpu.memory_space<smem>>, %arg2: memref<4xi32, #tpu.memory_space<smem>>, %arg3: memref<4xi32, #tpu.memory_space<smem>>) -> (i32, i32) {
    %0 = arith.index_cast %arg0 : i32 to index
    %1 = memref.load %arg2[%0] : memref<4xi32, #tpu.memory_space<smem>>
    %c0_i32 = arith.constant 0 : i32
    %c0_i32_0 = arith.constant 0 : i32
    return %c0_i32, %1 : i32, i32
  }
  func.func @transform_1(%arg0: i32, %arg1: memref<4xi32, #tpu.memory_space<smem>>, %arg2: memref<4xi32, #tpu.memory_space<smem>>, %arg3: memref<4xi32, #tpu.memory_space<smem>>) -> (i32, i32) {
    %0 = arith.index_cast %arg0 : i32 to index
    %1 = memref.load %arg2[%0] : memref<4xi32, #tpu.memory_space<smem>>
    %c0_i32 = arith.constant 0 : i32
    %c0_i32_0 = arith.constant 0 : i32
    return %1, %c0_i32 : i32, i32
  }
  func.func @transform_2(%arg0: i32, %arg1: memref<4xi32, #tpu.memory_space<smem>>, %arg2: memref<4xi32, #tpu.memory_space<smem>>, %arg3: memref<4xi32, #tpu.memory_space<smem>>) -> (i32, i32) {
    %c0_i32 = arith.constant 0 : i32
    %c0_i32_0 = arith.constant 0 : i32
    %c0_i32_1 = arith.constant 0 : i32
    return %c0_i32, %c0_i32_0 : i32, i32
  }
  func.func @transform_3(%arg0: i32, %arg1: memref<4xi32, #tpu.memory_space<smem>>, %arg2: memref<4xi32, #tpu.memory_space<smem>>, %arg3: memref<4xi32, #tpu.memory_space<smem>>) -> (i32, i32) {
    %c0_i32 = arith.constant 0 : i32
    %c0_i32_0 = arith.constant 0 : i32
    %c0_i32_1 = arith.constant 0 : i32
    return %c0_i32, %c0_i32_0 : i32, i32
  }
  func.func @transform_4(%arg0: i32, %arg1: memref<4xi32, #tpu.memory_space<smem>>, %arg2: memref<4xi32, #tpu.memory_space<smem>>, %arg3: memref<4xi32, #tpu.memory_space<smem>>) -> (i32, i32) {
    %c0_i32 = arith.constant 0 : i32
    %c0_i32_0 = arith.constant 0 : i32
    %c0_i32_1 = arith.constant 0 : i32
    return %c0_i32, %c0_i32_0 : i32, i32
  }
  func.func @transform_5(%arg0: i32, %arg1: memref<4xi32, #tpu.memory_space<smem>>, %arg2: memref<4xi32, #tpu.memory_space<smem>>, %arg3: memref<4xi32, #tpu.memory_space<smem>>) -> (i32, i32) {
    %0 = arith.index_cast %arg0 : i32 to index
    %1 = memref.load %arg1[%0] : memref<4xi32, #tpu.memory_space<smem>>
    %c0_i32 = arith.constant 0 : i32
    %c0_i32_0 = arith.constant 0 : i32
    return %1, %c0_i32 : i32, i32
  }
}

</mosaic_0001>

<bundles_post_ra>
// kernel: tpu_custom_call.1
= control target key start
LH: loop header
LB: loop body
LE: loop exit
PB: predicated region body
PF: predicated region fallthrough
CT: control target
= control target key end

     0   :  { %s2482_s0 = inlined_call_operand.hbm [shape: s32[4], index: 0, kind: input, shape index: {}]   ;;  %s2483_s3 = inlined_call_operand.vmem [shape: s32[1,256], index: 3, kind: input, shape index: {}]   ;;  %s2484_s4 = inlined_call_operand.hbm [shape: bf16[256,128], index: 4, kind: input, shape index: {}]   ;;  %s2485_s5 = inlined_call_operand.hbm [shape: bf16[128,128], index: 5, kind: input, shape index: {}]   ;;  %s2486_s6 = inlined_call_operand.vmem [shape: f32[2,128], index: 6, kind: input, shape index: {}]   ;;  %s2487_s7 = inlined_call_operand.hbm [shape: f32[128,128], index: 7, kind: input, shape index: {}]   ;;  %s2488_s8 = inlined_call_operand.hbm [shape: f32[64,128], index: 8, kind: output, shape index: {}]   ;;  %s2489_s1 = inlined_call_operand.vmem [shape: s32[4], index: 1, kind: input, shape index: {}]   ;;  %s2490_s2 = inlined_call_operand.vmem [shape: s32[4], index: 2, kind: input, shape index: {}]  }
   0x1   :  { %s1744_s29 = scalar_lea.hbm %s2482_s0, 16 }
   0x2   :  { %p1745_p0 = scmp.ne.s32.totalorder %s2482_s0, %s1744_s29  ;;  %p1748_p1 = scmp.lt.u32.totalorder %s1744_s29, %s2482_s0 }
   0x4   :  { %p1750_p2 = pnand %p1748_p1, %p1745_p0 }
   0x6   :  { %1753 = shalt.err (!%p1750_p2)  }
   0x7   :  { %s1962_s12 = smov [#allocation4]   ;;  %s15_s17 = sshll.u32 %s2489_s1, 4  ;;  %s16_s17 = int_to_ptr.vmem [resolvable:$true] %s15_s17 }
   0x8   :  { %14 = dma.hbm_to_smem %s2482_s0, 16, %s1962_s12, [#allocation3] }
   0x9   :  { %s19_s20 = sshll.u32 %s2490_s2, 4  ;;  %s1754_s21 = scalar_lea.vmem %s16_s17, 16  ;;  %s20_s20 = int_to_ptr.vmem [resolvable:$true] %s19_s20 }
   0xa   :  { %p1755_p3 = scmp.ne.s32.totalorder %s16_s17, %s1754_s21  ;;  %p1759_p4 = scmp.lt.s32.totalorder %s16_s17, %s16_s17 }
   0xb   :  { %p1760_p5 = scmp.lt.s32.totalorder %s1754_s21, %s1754_s21 }
   0xd   :  { %p1761_p6 = por %p1760_p5, %p1759_p4 }
   0xf   :  { %p1762_p7 = pnand %p1761_p6, %p1755_p3 }
  0x11   :  { %1765 = shalt.err (!%p1762_p7)  }
  0x12   :  { %s1963_s22 = smov [#allocation5]   ;;  %s1766_s0 = scalar_lea.vmem %s20_s20, 16 }
  0x13   :  { %18 = dma.vmem_to_smem %s16_s17, 16, %s1963_s22, [#allocation3] }
  0x14   :  { %p1767_p8 = scmp.ne.s32.totalorder %s20_s20, %s1766_s0  ;;  %p1771_p9 = scmp.lt.s32.totalorder %s20_s20, %s20_s20 }
  0x15   :  { %p1772_p10 = scmp.lt.s32.totalorder %s1766_s0, %s1766_s0 }
  0x17   :  { %p1773_p11 = por %p1772_p10, %p1771_p9 }
  0x19   :  { %p1774_p12 = pnand %p1773_p11, %p1767_p8 }
  0x1b   :  { %1777 = shalt.err (!%p1774_p12)  }
  0x1c   :  { %s1964_s1 = smov [#allocation6]  }
  0x1d   :  { %22 = dma.vmem_to_smem %s20_s20, 16, %s1964_s1, [#allocation3] }
  0x1e   :  { %1920 = dma.done.wait [#allocation3], 48 }
  0x1f   :  { %1921 = vsyncadd [#allocation3], 4294967248 }
  0x20   :  { %24 = sfence }
  0x21   :  { %25 = vsyncpa [#allocation8], 0 }
  0x22   :  { %27 = vsyncpa [#allocation8 + $0x1], 0 }
  0x23   :  { %28 = vsyncpa [#allocation11], 0 }
  0x24   :  { %29 = vsyncpa [#allocation9], 0 }
  0x25   :  { %31 = vsyncpa [#allocation9 + $0x1], 0  ;;  %s2041_s2 = smov 0   ;;  %s2043_s23 = smov 0  }
  0x26   :  { %s2045_s24 = smov 0   ;;  %s2047_s25 = smov 0  }
  0x27   :  { %s2049_s26 = smov 0   ;;  %s2051_s27 = smov 0  }
  0x28   :  { %s2053_s28 = smov 0  }
  0x29 LB: > { %2499 = sst [smem:[#allocation21_spill]] %s1944_s24  ;;  %s2075_s29 = sadd.s32 4294967295, %s1960_s28   ;;  %s1960_s28 = sphi %s2053_s28, %s2526_s28   ;;  %s1956_s27 = sphi %s2051_s27, %s2525_s27   ;;  %s1952_s26 = sphi %s2049_s26, %s2524_s26   ;;  %s1948_s25 = sphi %s2047_s25, %s2523_s25   ;;  %s1944_s24 = sphi %s2045_s24, %s2520_s24   ;;  %s1940_s23 = sphi %s2043_s23, %s2522_s23   ;;  %s1936_s2 = sphi %s2041_s2, %s2521_s2  }
  0x2a   : > { %s1274_s30 = sadd.s32 4294967294, %s1960_s28   ;;  %s2079_s9 = sadd.s32 1, %s1960_s28  }
  0x2b   : > { %p87_p13 = scmp.ne.s32.totalorder %s1952_s26, %s1948_s25  ;;  %p2491_p0 = scmp.eq.s32.totalorder %s2075_s29, 0 }
  0x2c   : > { %s160_s10 = sld [smem:[#allocation4 + %s1960_s28]]  ;;  %s165_s12 = sadd.s32 1, %s1944_s24 }
  0x2d   : > { %s161_s11 = sld [smem:[#allocation4 + %s2079_s9]]  ;;  %p2088_p1 = por %p2491_p0, %p87_p13 }
  0x2e   : > { %p175_p2 = scmp.ne.s32.totalorder %s1944_s24, %s1940_s23  ;;  %p176_p3 = scmp.eq.s32.totalorder %s2075_s29, 3 }
  0x2f   : > { %s2500_s13 = scalar_select %p2088_p1, 1, 0 }
  0x30   : > { %p181_p4 = scmp.ne.s32.totalorder %s1940_s23, %s1936_s2  ;;  %p182_p5 = scmp.eq.s32.totalorder %s1274_s30, 3 }
  0x31   : > { %p1275_p6 = scmp.ge.s32.totalorder %s1960_s28, 1  ;;  %p2098_p7 = por %p176_p3, %p175_p2 }
  0x32   : > { %p189_p8 = scmp.lt.s32.totalorder %s1960_s28, 5  ;;  %p2103_p9 = por %p182_p5, %p181_p4 }
  0x33   : > { %s2501_s14 = scalar_select %p2098_p7, 1, 0 }
  0x34   : > { %s2502_s15 = scalar_select %p2103_p9, 1, 0 }
  0x35   : > { %s162_s16 = ssub.s32 %s160_s10, %s161_s11  ;;  %p2107_p10 = pnand %p1275_p6, %p189_p8 }
  0x36   : > { %2503 = sst [smem:[#allocation22_spill]] %s2502_s15  ;;  %p163_p11 = scmp.eq.s32.totalorder %s162_s16, 0 }
  0x37   : > { %s2504_s17 = scalar_select %p2107_p10, 1, 0 }
  0x38   : > { %p1587_p12 = pneg %p2107_p10  ;;  %s1965_s18 = smov [#allocation10]  }
  0x39   : > { %s201_s19 = sshll.u32 %s1965_s18, 4  ;;  %s1778_s1 = scalar_lea.hbm %s2485_s5, 1024  ;;  %s202_s19 = int_to_ptr.vmem [resolvable:$true] %s201_s19 }
  0x3a   : > { %s2114_s20 = scalar_select %p163_p11, %s1944_s24, %s165_s12  }
  0x3b   : > { %p2118_p13 = pnand %p1587_p12, %p2491_p0  ;;  %p1779_p2 = scmp.ne.s32.totalorder %s2485_s5, %s1778_s1 }
  0x3c   : > { %2505 = sst [smem:[#allocation23_spill]] %s2114_s20  ;;  %p1785_p6 = scmp.lt.u32.totalorder %s1778_s1, %s2485_s5 }
  0x3d   : > { %p1780_p3 = pneg %p2118_p13 }
  0x3f   : > { %p1781_p4 = pnand %p1780_p3, %p1779_p2 }
  0x41   : > { %p1782_p5 = pneg %p1781_p4 }
  0x43   : > { %p1787_p8 = pnand %p1785_p6, %p1782_p5 }
  0x45   : > { %1790 = shalt.err (!%p1787_p8)
}
  0x46   : > { %s1791_s12 = scalar_lea.vmem %s202_s19, 1024  ;;  %p1799_p9 = scmp.lt.s32.totalorder %s202_s19, %s202_s19 }
  0x47   : > { %p1792_p11 = scmp.ne.s32.totalorder %s202_s19, %s1791_s12  ;;  %p1800_p7 = scmp.lt.s32.totalorder %s1791_s12, %s1791_s12 }
  0x49   : > { %p1794_p12 = pnand %p1792_p11, %p1780_p3  ;;  %p1801_p1 = por %p1800_p7, %p1799_p9 }
  0x4b   : > { %p1795_p0 = pneg %p1794_p12 }
  0x4d   : > { %p1802_p10 = pnand %p1801_p1, %p1795_p0 }
  0x4f   : > { %1805 = shalt.err (!%p1802_p10)
}
  0x50   : > { %s2497_s16 = smov 64   ;;  %s2498_s18 = smov 4  }
  0x51   : > { %1590 = dma.hbm_to_vmem [thread:$0]  (!%p2118_p13), %s2485_s5, 1024, %s202_s19, [#allocation11], %s2497_s16, %s2497_s16, %s2498_s18  }
  0x52   : > { %s1968_s1 = smov [#allocation12]   ;;  %s1806_s11 = scalar_lea.hbm %s2487_s7, 2048 }
  0x53   : > { %s217_s25 = sshll.u32 %s1968_s1, 4  ;;  %p1807_p0 = scmp.ne.s32.totalorder %s2487_s7, %s1806_s11  ;;  %s218_s25 = int_to_ptr.vmem [resolvable:$true] %s217_s25 }
  0x54   : > { %p1813_p9 = scmp.lt.u32.totalorder %s1806_s11, %s2487_s7 }
  0x55   : > { %p1809_p1 = pnand %p1807_p0, %p1780_p3 }
  0x57   : > { %p1810_p7 = pneg %p1809_p1 }
  0x59   : > { %p1815_p10 = pnand %p1813_p9, %p1810_p7 }
  0x5b   : > { %1818 = shalt.err (!%p1815_p10)
}
  0x5c   : > { %s1819_s19 = scalar_lea.vmem %s218_s25, 2048  ;;  %p1827_p6 = scmp.lt.s32.totalorder %s218_s25, %s218_s25 }
  0x5d   : > { %p1820_p2 = scmp.ne.s32.totalorder %s218_s25, %s1819_s19  ;;  %p1828_p8 = scmp.lt.s32.totalorder %s1819_s19, %s1819_s19 }
  0x5f   : > { %p1822_p4 = pnand %p1820_p2, %p1780_p3  ;;  %p1829_p11 = por %p1828_p8, %p1827_p6 }
  0x61   : > { %p1823_p5 = pneg %p1822_p4 }
  0x63   : > { %p1830_p12 = pnand %p1829_p11, %p1823_p5 }
  0x65   : > { %1833 = shalt.err (!%p1830_p12)
}
  0x66   : > { %s1969_s20 = smov 128   ;;  %s1970_s24 = smov 8  }
  0x67   : > { %1593 = dma.hbm_to_vmem [thread:$0]  (!%p2118_p13), %s2487_s7, 2048, %s218_s25, [#allocation11], %s1969_s20, %s1969_s20, %s1970_s24  }
  0x68   : > { %s69_s0 = sld [smem:[#allocation5 + %s1960_s28]]  ;;  %p81_p3 = scmp.ne.s32.totalorder %s1956_s27, %s1952_s26 }
  0x69   : > { %s70_s1 = sld [smem:[#allocation5 + %s2079_s9]]  ;;  %p82_p0 = scmp.eq.s32.totalorder %s1960_s28, 0 }
  0x6a   : > { %s239_s30 = sand.u32 1, %s1956_s27   ;;  %s74_s10 = sadd.s32 1, %s1956_s27 }
  0x6b   : > { %p83_p1 = por %p82_p0, %p81_p3  ;;  %p1606_p7 = scmp.lt.s32.totalorder %s1960_s28, 4 }
  0x6c   : > { %s1279_s12 = sshll.u32 %s239_s30, 6 }
  0x6d   : > { %p2175_p10 = pnand %p1606_p7, %p83_p1  ;;  %s243_s24 = scalar_lea.vmem [#allocation7], %s1279_s12 }
  0x6e   : > { %s1575_s21 = scalar_select %p83_p1, [#allocation5], [#allocation14] }
  0x6f   : > { %s71_s11 = ssub.s32 %s69_s0, %s70_s1  ;;  %s251_s22 = sshll.u32 %s243_s24, 4  ;;  %s2183_s22 = int_to_ptr.vmem [resolvable:$true] %s251_s22 }
  0x70   : > { %p72_p9 = scmp.eq.s32.totalorder %s71_s11, 0  ;;  %s2528_s21 = smov (!%p1606_p7, %s1575_s21), [#allocation16] }
  0x71   : > { %s1576_s25 = scalar_select %p83_p1, %s1960_s28, 0 }
  0x72   : > { %s2180_s15 = scalar_select %p72_p9, %s1956_s27, %s74_s10  }
  0x73   : > { %s2530_s25 = smov (!%p1606_p7, %s1576_s25), 0  ;;  %s2190_s10 = scalar_lea.sflag [#allocation8], %s239_s30 }
  0x74   : > { %s244_s20 = sld [smem:[%s2528_s21 + %s2530_s25]]  ;;  %p1836_p2 = pneg %p2175_p10 }
  0x75   : > { %s1839_s25 = scalar_lea.hbm %s2484_s4, 2048 }
  0x7a   : > { %s1342_s0 = sshll.u32 %s244_s20, 10 }
  0x7b   : > { %s2188_s16 = scalar_lea.hbm %s2484_s4, %s1342_s0 }
  0x7c   : > { %s1834_s18 = scalar_lea.hbm %s2188_s16, 1024  ;;  %p1840_p6 = scmp.lt.u32.totalorder %s2188_s16, %s2484_s4 }
  0x7d   : > { %p1835_p13 = scmp.ne.s32.totalorder %s2188_s16, %s1834_s18  ;;  %p1841_p8 = scmp.lt.u32.totalorder %s1839_s25, %s1834_s18 }
  0x7e   : > { %p1843_p12 = scmp.lt.u32.totalorder %s1834_s18, %s2188_s16 }
  0x7f   : > { %p1837_p4 = pnand %p1836_p2, %p1835_p13  ;;  %p1842_p11 = por %p1841_p8, %p1840_p6 }
  0x81   : > { %p1838_p5 = pneg %p1837_p4  ;;  %p1844_p3 = por %p1843_p12, %p1842_p11 }
  0x83   : > { %p1845_p0 = pnand %p1844_p3, %p1838_p5 }
  0x85   : > { %1848 = shalt.err (!%p1845_p0)
}
  0x86   : > { %s1849_s30 = scalar_lea.vmem %s2183_s22, 1024  ;;  %s1971_s0 = smov [#allocation7]  }
  0x87   : > { %p1850_p1 = scmp.ne.s32.totalorder %s2183_s22, %s1849_s30  ;;  %s1854_s1 = sshll.u32 %s1971_s0, 4  ;;  %s1855_s1 = int_to_ptr.vmem [resolvable:$false] %s1854_s1 }
  0x88   : > { %s1856_s11 = scalar_lea.vmem %s1855_s1, 2048  ;;  %p1857_p13 = scmp.lt.s32.totalorder %s2183_s22, %s1855_s1 }
  0x89   : > { %p1852_p7 = pnand %p1850_p1, %p1836_p2  ;;  %p1858_p4 = scmp.lt.s32.totalorder %s1856_s11, %s1849_s30 }
  0x8b   : > { %p1853_p9 = pneg %p1852_p7  ;;  %p1859_p6 = por %p1858_p4, %p1857_p13 }
  0x8d   : > { %p1860_p8 = pnand %p1859_p6, %p1853_p9 }
  0x8f   : > { %1863 = shalt.err (!%p1860_p8)
}
  0x90   : > { %s2508_s18 = smov 4   ;;  %s2509_s12 = smov 64  }
  0x91   : > { %1599 = dma.hbm_to_vmem [thread:$0]  (!%p2175_p10), %s2188_s16, 1024, %s2183_s22, %s2190_s10, %s2509_s12, %s2509_s12, %s2508_s18  }
  0x92   : > { %p2510_p2 = scmp.ne.s32.totalorder %s2504_s17, 0 }
  0x93   : > { %s265_s21 = sand.u32 (!%p2510_p2), 1, %s1952_s26   ;;  %p2511_p5 = scmp.ne.s32.totalorder (!%p2510_p2), %s2500_s13, 0 }
  0x94   : > { %263 = sbr.rel (%p2510_p2) target bundleno = 1338 (0x53a), region = 40  ;;  %s1283_s25 = sshll.u32 (!%p2510_p2), %s265_s21, 6 }
  0x95   : > { %s266_s20 = scalar_lea.sflag (!%p2510_p2), [#allocation8], %s265_s21  ;;  %s2224_s24 = scalar_lea.vmem (!%p2510_p2), [#allocation7], %s1283_s25 }
  0x9b   : > { %1923 = dma.done.wait (%p2511_p5), %s266_s20, 1024  }
  0x9c   : > { %1925 = vsyncadd (%p2511_p5), %s266_s20, 4294966272  ;;  %p2512_p11 = scmp.eq.s32.totalorder %s2075_s29, 0 }
  0x9e   : > { %1927 = dma.done.wait (%p2512_p11), [#allocation11], 3072   ;;  %p2513_p10 = pmov %p2512_p11 }
  0x9f   : > { %s305_s17 = sand.u32 1, %s1940_s23   ;;  %s308_s16 = sld [smem:[#allocation5 + %s2075_s29]] }
  0xa0   : > { %1929 = vsyncadd (%p2513_p10), [#allocation11], 4294964224  ;;  %s2237_s19 = sld [smem:[#allocation6 + %s2075_s29]]  ;;  %s1286_s13 = sshll.u32 %s305_s17, 5 }
  0xa1   : > { %s2250_s18 = scalar_lea.vmem [#allocation13], %s1286_s13 }
  0xa5   : > { %p309_p12 = scmp.lt.s32.totalorder %s308_s16, 1 }
  0xa6   : > { %s319_s22 = sand.u32 1, %s2237_s19  ;;  %s321_s10 = sand.u32 2, %s2237_s19 }
  0xa7   : > { %s323_s30 = sand.u32 4, %s2237_s19  ;;  %s2532_s16 = smov (!%p309_p12, %s308_s16), 1 }
  0xa8   : > { %s311_s11 = scalar_lea.vmem %s2483_s3, %s2532_s16  ;;  %p1287_p3 = scmp.eq.s32.totalorder %s319_s22, 0 }
  0xa9   : > { %v1972_v0 = vmov (!%p1287_p3), 0.0  }
  0xaa   : > { %327 = sbr.rel (%p1287_p3) target bundleno = 177 (0xb1), region = 56  ;;  %328 = vst [vmem:[#allocation2] sm:$0xff] (!%p1287_p3), %v1972_v0  ;;  %329 = vst [vmem:[#allocation2 + $0x8] sm:$0xff] (!%p1287_p3), %v1972_v0 }
  0xab   : > { %330 = vst [vmem:[#allocation2 + $0x10] sm:$0xff] (!%p1287_p3), %v1972_v0  ;;  %331 = vst [vmem:[#allocation2 + $0x18] sm:$0xff] (!%p1287_p3), %v1972_v0 }
  0xb1 PF: > { %p1288_p0 = scmp.eq.s32.totalorder %s323_s30, 0 }
  0xb2   : > { %v1680_v1 = vld [vmem:[#allocation10] sm:$0xff] (!%p1288_p0)   ;;  %v1681_v2 = vld [vmem:[#allocation10 + $0x8] sm:$0xff] (!%p1288_p0)   ;;  %v1682_v3 = vld [vmem:[#allocation10 + $0x10] sm:$0xff] (!%p1288_p0)   ;;  %vm738_vm4 = vcmask (!%p1288_p0), 1041408   ;;  %s1973_s25 = smov (!%p1288_p0), 94   ;;  %s911_s20 = sld [smem:[#allocation4 + %s2075_s29]] (!%p1288_p0) }
  0xb3   : > { %334 = sbr.rel (%p1288_p0) target bundleno = 1028 (0x404), region = 60  ;;  %1407 = vmatprep.subr.bf16.mxu0 (!%p1288_p0), %v1680_v1  ;;  %v1683_v4 = vld [vmem:[#allocation10 + $0x18] sm:$0xff] (!%p1288_p0)   ;;  %v1688_v5 = vld [vmem:[%s2224_s24] sm:$0xff] (!%p1288_p0)   ;;  %v1685_v7 = vld [vmem:[#allocation10 + $0x28] sm:$0xff] (!%p1288_p0)  }
  0xb4   : > { %1408 = vmatpush3.bf16.msra.mxu0 (!%p1288_p0), %v1680_v1  ;;  %1423 = vmatprep.mubr.bf16.mxu0 (!%p1288_p0), %v1688_v5  ;;  %v1684_v6 = vld [vmem:[#allocation10 + $0x20] sm:$0xff] (!%p1288_p0)   ;;  %v1686_v8 = vld [vmem:[#allocation10 + $0x30] sm:$0xff] (!%p1288_p0)   ;;  %v1687_v9 = vld [vmem:[#allocation10 + $0x38] sm:$0xff] (!%p1288_p0)  }
  0xb5   : > { %1409 = vmatprep.subr.bf16.mxu0 (!%p1288_p0), %v1681_v2  ;;  %v1689_v10 = vld [vmem:[%s2224_s24 + $0x8] sm:$0xff] (!%p1288_p0)   ;;  %v1690_v11 = vld [vmem:[%s2224_s24 + $0x10] sm:$0xff] (!%p1288_p0)   ;;  %v1691_v12 = vld [vmem:[%s2224_s24 + $0x18] sm:$0xff] (!%p1288_p0)  }
  0xb6   : > { %v1692_v13 = vld [vmem:[%s2224_s24 + $0x20] sm:$0xff] (!%p1288_p0)   ;;  %v1693_v14 = vld [vmem:[%s2224_s24 + $0x28] sm:$0xff] (!%p1288_p0)   ;;  %v1694_v15 = vld [vmem:[%s2224_s24 + $0x30] sm:$0xff] (!%p1288_p0)  }
  0xb7   : > { %v1695_v16 = vld [vmem:[%s2224_s24 + $0x38] sm:$0xff] (!%p1288_p0)   ;;  %v656_v35 = vld [vmem:[%s2486_s6] sm:$0x3] (!%p1288_p0) }
  0xb8   : > { %1410 = vmatpush3.bf16.msra.mxu0 (!%p1288_p0), %v1681_v2  ;;  %1439 = vmatprep.subr.msk.mxu1 (!%p1288_p0), %vm738_vm4, %v656_v35  ;;  %s1322_s24 = sshll.u32 (!%p1288_p0), %s911_s20, 5 }
  0xb9   : > { %1411 = vmatprep.subr.bf16.mxu0 (!%p1288_p0), %v1682_v3  ;;  %1440 = vmatpush3.msk.msra.mxu1 (!%p1288_p0), %vm738_vm4, %v656_v35 }
  0xbc   : > { %1412 = vmatpush3.bf16.msra.mxu0 %v1682_v3 }
  0xbd   : > { %1413 = vmatprep.subr.bf16.mxu0 %v1683_v4 }
  0xc0   : > { %1414 = vmatpush3.bf16.msra.mxu0 %v1683_v4 }
  0xc1   : > { %1415 = vmatprep.subr.bf16.mxu0 %v1684_v6 }
  0xc4   : > { %1416 = vmatpush3.bf16.msra.mxu0 %v1684_v6 }
  0xc5   : > { %1417 = vmatprep.subr.bf16.mxu0 %v1685_v7 }
  0xc8   : > { %1418 = vmatpush3.bf16.msra.mxu0 %v1685_v7 }
  0xc9   : > { %1419 = vmatprep.subr.bf16.mxu0 %v1686_v8 }
  0xcc   : > { %1420 = vmatpush3.bf16.msra.mxu0 %v1686_v8 }
  0xcd   : > { %1421 = vmatprep.subr.bf16.mxu0 %v1687_v9 }
  0xd0   : > { %1422 = vmatpush3.bf16.msra.mxu0 %v1687_v9 }
  0xd3   : > { %1424 = vmatmul.mubr.bf16.vlgmr.msra.gmra.mrb[0].mxu0 %v1689_v10 }
  0xd4   : > { %1427 = vmatprep.mubr.bf16.mxu0 %v1690_v11 }
  0xdb   : > { %1428 = vmatmul.mubr.bf16.gmra.mrb[4].mxu0 %v1691_v12 }
  0xdc   : > { %1431 = vmatprep.mubr.bf16.mxu0 %v1692_v13 }
  0xe3   : > { %1432 = vmatmul.mubr.bf16.gmra.mrb[8].mxu0 %v1693_v14 }
  0xe4   : > { %1435 = vmatprep.mubr.bf16.mxu0 %v1694_v15 }
  0xeb   : > { %1436 = vmatmul.mubr.bf16.gmra.mrb[12].mxu0 %v1695_v16 }
 0x1a6   : > { %v2260_v17 = vpop.f32.mrb[0].mxu0 }
 0x1a7   : > { %vm562_vm0 = vcmp.gt.f32.partialorder %v2260_v17, 0.0  ;;  %v578_v18 = vmul.f32 0.2, %v2260_v17  ;;  %v2264_v19 = vpop.f32.mrb[1].mxu0 }
 0x1a8   : > { %vm560_vm1 = vcmp.gt.f32.partialorder %v2264_v19, 0.0  ;;  %v576_v20 = vmul.f32 0.2, %v2264_v19  ;;  %v2268_v21 = vpop.f32.mrb[2].mxu0 }
 0x1a9   : > { %v594_v22 = vsel %vm562_vm0, %v2260_v17, %v578_v18  ;;  %vm563_vm2 = vcmp.gt.f32.partialorder %v2268_v21, 0.0  ;;  %v579_v23 = vmul.f32 0.2, %v2268_v21  ;;  %v2273_v24 = vpop.f32.mrb[3].mxu0 }
 0x1aa   : > { %v610_v25 = vsub.f32 0.0, %v594_v22  ;;  %v592_v26 = vsel %vm560_vm1, %v2264_v19, %v576_v20  ;;  %vm561_vm3 = vcmp.gt.f32.partialorder %v2273_v24, 0.0  ;;  %v577_v27 = vmul.f32 0.2, %v2273_v24 }
 0x1ab   : > { %v608_v28 = vsub.f32 0.0, %v592_v26  ;;  %v595_v29 = vsel %vm563_vm2, %v2268_v21, %v579_v23  ;;  %vm705_vm1 = vcmask 15360  }
 0x1ac   : > { %v628_v30 = vmul.f32 1.442695, %v610_v25  ;;  %v611_v31 = vsub.f32 0.0, %v595_v29  ;;  %v593_v32 = vsel %vm561_vm3, %v2273_v24, %v577_v27 }
 0x1ad   : > { %v624_v33 = vmul.f32 1.442695, %v608_v28  ;;  %v609_v34 = vsub.f32 0.0, %v593_v32 }
 0x1ae   : > { %1696 = vpow2.f32 %v628_v30  ;;  %v630_v36 = vmul.f32 1.442695, %v611_v31  ;;  %v2283_v37 = vpop.f32.mrb[4].mxu0 }
 0x1af   : > { %1698 = vpow2.f32 %v624_v33  ;;  %v626_v38 = vmul.f32 1.442695, %v609_v34  ;;  %vm566_vm5 = vcmp.gt.f32.partialorder %v2283_v37, 0.0  ;;  %v582_v39 = vmul.f32 0.2, %v2283_v37  ;;  %v2287_v40 = vpop.f32.mrb[5].mxu0 }
 0x1b0   : > { %vm564_vm6 = vcmp.gt.f32.partialorder %v2287_v40, 0.0  ;;  %v580_v41 = vmul.f32 0.2, %v2287_v40  ;;  %v2291_v42 = vpop.f32.mrb[6].mxu0  ;;  %1700 = vpow2.f32 %v630_v36 }
 0x1b1   : > { %v598_v43 = vsel %vm566_vm5, %v2283_v37, %v582_v39  ;;  %vm567_vm7 = vcmp.gt.f32.partialorder %v2291_v42, 0.0  ;;  %v583_v44 = vmul.f32 0.2, %v2291_v42  ;;  %v2296_v45 = vpop.f32.mrb[7].mxu0  ;;  %1702 = vpow2.f32 %v626_v38 }
 0x1b2   : > { %v614_v46 = vsub.f32 0.0, %v598_v43  ;;  %v596_v47 = vsel %vm564_vm6, %v2287_v40, %v580_v41  ;;  %vm565_vm8 = vcmp.gt.f32.partialorder %v2296_v45, 0.0  ;;  %v581_v48 = vmul.f32 0.2, %v2296_v45 }
 0x1b3   : > { %v612_v49 = vsub.f32 0.0, %v596_v47  ;;  %v599_v50 = vsel %vm567_vm7, %v2291_v42, %v583_v44 }
 0x1b4   : > { %v615_v51 = vsub.f32 0.0, %v599_v50  ;;  %v597_v52 = vsel %vm565_vm8, %v2296_v45, %v581_v48  ;;  %v636_v55 = vmul.f32 1.442695, %v614_v46 }
 0x1b5   : > { %v632_v53 = vmul.f32 1.442695, %v612_v49  ;;  %v613_v54 = vsub.f32 0.0, %v597_v52 }
 0x1b6   : > { %v2303_v56 = vpop.f32.mrb[8].mxu0  ;;  %v638_v61 = vmul.f32 1.442695, %v615_v51 }
 0x1b7   : > { %1704 = vpow2.f32 %v632_v53  ;;  %v634_v57 = vmul.f32 1.442695, %v613_v54  ;;  %vm570_vm9 = vcmp.gt.f32.partialorder %v2303_v56, 0.0  ;;  %v586_v58 = vmul.f32 0.2, %v2303_v56  ;;  %v2307_v59 = vpop.f32.mrb[9].mxu0 }
 0x1b8   : > { %v1697_v60 = vpop.eup %1696  ;;  %vm568_vm10 = vcmp.gt.f32.partialorder %v2307_v59, 0.0  ;;  %v584_v62 = vmul.f32 0.2, %v2307_v59  ;;  %v2311_v63 = vpop.f32.mrb[10].mxu0 }
 0x1b9   : > { %v1699_v0 = vpop.eup %1698  ;;  %1706 = vpow2.f32 %v634_v57  ;;  %v602_v1 = vsel %vm570_vm9, %v2303_v56, %v586_v58  ;;  %vm571_vm11 = vcmp.gt.f32.partialorder %v2311_v63, 0.0  ;;  %v587_v2 = vmul.f32 0.2, %v2311_v63  ;;  %677 = vrot.lane.b32.xlu1 %v1697_v60, %s1973_s25  ;;  %v2317_v3 = vpop.f32.mrb[11].mxu0 }
 0x1ba   : > { %v618_v4 = vsub.f32 0.0, %v602_v1  ;;  %v600_v5 = vsel %vm568_vm10, %v2307_v59, %v584_v62  ;;  %vm569_vm12 = vcmp.gt.f32.partialorder %v2317_v3, 0.0  ;;  %v585_v6 = vmul.f32 0.2, %v2317_v3  ;;  %673 = vrot.lane.b32.xlu0 %v1699_v0, %s1973_s25  ;;  %v1701_v7 = vpop.eup %1700 }
 0x1bb   : > { %1708 = vpow2.f32 %v636_v55  ;;  %v616_v8 = vsub.f32 0.0, %v600_v5  ;;  %v603_v9 = vsel %vm571_vm11, %v2311_v63, %v587_v2  ;;  %v1703_v12 = vpop.eup %1702 }
 0x1bc   : > { %v619_v10 = vsub.f32 0.0, %v603_v9  ;;  %v601_v11 = vsel %vm569_vm12, %v2317_v3, %v585_v6  ;;  %1710 = vpow2.f32 %v638_v61  ;;  %v644_v15 = vmul.f32 1.442695, %v618_v4 }
 0x1bd   : > { %v640_v13 = vmul.f32 1.442695, %v616_v8  ;;  %v617_v14 = vsub.f32 0.0, %v601_v11  ;;  %679 = vrot.lane.b32.xlu1 %v1701_v7, %s1973_s25 }
 0x1be   : > { %675 = vrot.lane.b32.xlu0 %v1703_v12, %s1973_s25  ;;  %v2327_v16 = vpop.f32.mrb[12].mxu0  ;;  %v646_v23 = vmul.f32 1.442695, %v619_v10 }
 0x1bf   : > { %1712 = vpow2.f32 %v640_v13  ;;  %v642_v18 = vmul.f32 1.442695, %v617_v14  ;;  %vm574_vm13 = vcmp.gt.f32.partialorder %v2327_v16, 0.0  ;;  %v590_v20 = vmul.f32 0.2, %v2327_v16  ;;  %v2331_v22 = vpop.f32.mrb[13].mxu0 }
 0x1c0   : > { %vm572_vm14 = vcmp.gt.f32.partialorder %v2331_v22, 0.0  ;;  %v588_v25 = vmul.f32 0.2, %v2331_v22  ;;  %v2335_v26 = vpop.f32.mrb[14].mxu0  ;;  %v913_v14 = vlaneseq }
 0x1c1   : > { %v1705_v27 = vpop.eup %1704  ;;  %1714 = vpow2.f32 %v642_v18  ;;  %v606_v28 = vsel %vm574_vm13, %v2327_v16, %v590_v20  ;;  %vm575_vm15 = vcmp.gt.f32.partialorder %v2335_v26, 0.0  ;;  %v591_v29 = vmul.f32 0.2, %v2335_v26  ;;  %v2340_v30 = vpop.f32.mrb[15].mxu0 }
 0x1c2   : > { %v604_v31 = vsel %vm572_vm14, %v2331_v22, %v588_v25  ;;  %vm573_vm0 = vcmp.gt.f32.partialorder %v2340_v30, 0.0  ;;  %v589_v32 = vmul.f32 0.2, %v2340_v30  ;;  %681 = vrot.lane.b32.xlu0 %v1705_v27, %s1973_s25  ;;  %1716 = vpow2.f32 %v644_v15 }
 0x1c3   : > { %v1707_v33 = vpop.eup %1706  ;;  %v622_v34 = vsub.f32 0.0, %v606_v28  ;;  %v620_v35 = vsub.f32 0.0, %v604_v31  ;;  %v607_v36 = vsel %vm575_vm15, %v2335_v26, %v591_v29  ;;  %1718 = vpow2.f32 %v646_v23  ;;  %v1323_v29 = vld [vmem:[%s311_s11] ss:$0 sm:$0xff] }
 0x1c4   : > { %v605_v38 = vsel %vm573_vm0, %v2340_v30, %v589_v32  ;;  %683 = vrot.lane.b32.xlu1 %v1707_v33, %s1973_s25  ;;  %v623_v43 = vsub.f32 0.0, %v607_v36  ;;  %v914_v15 = vshrl.u32 %v913_v14, 7  ;;  %v918_v20 = vstv %s1322_s24 }
 0x1c5   : > { %v1709_v39 = vpop.eup %1708  ;;  %v648_v41 = vmul.f32 1.442695, %v620_v35  ;;  %v621_v44 = vsub.f32 0.0, %v605_v38  ;;  %v652_v47 = vmul.f32 1.442695, %v622_v34 }
 0x1c6   : > { %685 = vrot.lane.b32.xlu0 %v1709_v39, %s1973_s25  ;;  %v1711_v46 = vpop.eup %1710  ;;  %v654_v50 = vmul.f32 1.442695, %v623_v43  ;;  %v915_v18 = vadd.s32 8, %v914_v15  ;;  %v916_v23 = vadd.s32 16, %v914_v15  ;;  %v917_v25 = vadd.s32 24, %v914_v15 }
 0x1c7   : > { %1720 = vpow2.f32 %v648_v41  ;;  %v650_v48 = vmul.f32 1.442695, %v621_v44  ;;  %v919_v27 = vadd.s32 %v918_v20, %v914_v15  ;;  %v1974_v33 = vmov 1.0|1.0  }
 0x1c8   : > { %687 = vrot.lane.b32.xlu1 %v1711_v46, %s1973_s25  ;;  %v920_v28 = vadd.s32 %v918_v20, %v915_v18  ;;  %v921_v31 = vadd.s32 %v918_v20, %v916_v23  ;;  %v922_v32 = vadd.s32 %v918_v20, %v917_v25 }
 0x1c9   : > { %v1713_v49 = vpop.eup %1712  ;;  %1722 = vpow2.f32 %v650_v48  ;;  %vm928_vm2 = vcmp.eq.s32.totalorder %v919_v27, %v1323_v29 }
 0x1ca   : > { %689 = vrot.lane.b32.xlu0 %v1713_v49, %s1973_s25  ;;  %1724 = vpow2.f32 %v652_v47  ;;  %vm929_vm3 = vcmp.eq.s32.totalorder %v920_v28, %v1323_v29  ;;  %vm930_vm5 = vcmp.eq.s32.totalorder %v921_v31, %v1323_v29  ;;  %vm931_vm6 = vcmp.eq.s32.totalorder %v922_v32, %v1323_v29 }
 0x1cb   : > { %v1715_v51 = vpop.eup %1714  ;;  %1726 = vpow2.f32 %v654_v50  ;;  %vm1328_vm4 = vmpackc.low %vm929_vm3, %vm928_vm2 }
 0x1cc   : > { %691 = vrot.lane.b32.xlu1 %v1715_v51, %s1973_s25  ;;  %v1717_v52 = vpop.eup %1716  ;;  %vm2381_vm7 = vmpackc.low %vm931_vm6, %vm930_vm5 }
 0x1cd   : > { %v1719_v53 = vpop.eup %1718 }
 0x1ce   : > { %693 = vrot.lane.b32.xlu0 %v1717_v52, %s1973_s25 }
 0x1d0   : > { %695 = vrot.lane.b32.xlu1 %v1719_v53, %s1973_s25 }
 0x1d1   : > { %v1721_v54 = vpop.eup %1720 }
 0x1d2   : > { %697 = vrot.lane.b32.xlu0 %v1721_v54, %s1973_s25 }
 0x1d3   : > { %v1723_v55 = vpop.eup %1722 }
 0x1d4   : > { %699 = vrot.lane.b32.xlu1 %v1723_v55, %s1973_s25  ;;  %v1725_v57 = vpop.eup %1724 }
 0x1d5   : > { %v1727_v58 = vpop.eup %1726 }
 0x1d6   : > { %701 = vrot.lane.b32.xlu0 %v1725_v57, %s1973_s25 }
 0x1d8   : > { %703 = vrot.lane.b32.xlu1 %v1727_v58, %s1973_s25 }
 0x22b   : > { %v678_v60 = vpop.permute.xlu1 %677 }
 0x22c   : > { %v674_v61 = vpop.permute.xlu0 %673 }
 0x22d   : > { %1441 = vmatprep.mubr.msk.f32.mxu1 %vm705_vm1, %v674_v61 }
 0x22f   : > { %v680_v0 = vpop.permute.xlu1 %679 }
 0x230   : > { %v676_v62 = vpop.permute.xlu0 %675 }
 0x231   : > { %1442 = vmatmul.mubr.msk.f32.vlgmr.msra.gmra.mrb[0].mxu1 %vm705_vm1, %v676_v62 }
 0x232   : > { %1444 = vmatprep.mubr.msk.f32.mxu1 %vm705_vm1, %v678_v60 }
 0x234   : > { %v682_v1 = vpop.permute.xlu0 %681 }
 0x235   : > { %1445 = vmatmul.mubr.msk.f32.gmra.mrb[2].mxu1 %vm705_vm1, %v680_v0 }
 0x236   : > { %1447 = vmatprep.mubr.msk.f32.mxu1 %vm705_vm1, %v682_v1  ;;  %v684_v2 = vpop.permute.xlu1 %683 }
 0x238   : > { %v686_v4 = vpop.permute.xlu0 %685 }
 0x239   : > { %1448 = vmatmul.mubr.msk.f32.gmra.mrb[4].mxu1 %vm705_vm1, %v684_v2 }
 0x23a   : > { %1450 = vmatprep.mubr.msk.f32.mxu1 %vm705_vm1, %v686_v4  ;;  %v688_v5 = vpop.permute.xlu1 %687 }
 0x23c   : > { %v690_v6 = vpop.permute.xlu0 %689 }
 0x23d   : > { %1451 = vmatmul.mubr.msk.f32.gmra.mrb[6].mxu1 %vm705_vm1, %v688_v5 }
 0x23e   : > { %1453 = vmatprep.mubr.msk.f32.mxu1 %vm705_vm1, %v690_v6  ;;  %v692_v7 = vpop.permute.xlu1 %691 }
 0x240   : > { %v694_v8 = vpop.permute.xlu0 %693 }
 0x241   : > { %1454 = vmatmul.mubr.msk.f32.gmra.mrb[8].mxu1 %vm705_vm1, %v692_v7  ;;  %v942_v7 = vld [vmem:[#allocation2] sm:$0xff] }
 0x242   : > { %1456 = vmatprep.mubr.msk.f32.mxu1 %vm705_vm1, %v694_v8  ;;  %v696_v9 = vpop.permute.xlu1 %695  ;;  %v945_v8 = vld [vmem:[#allocation2 + $0x18] sm:$0xff] }
 0x244   : > { %v698_v10 = vpop.permute.xlu0 %697 }
 0x245   : > { %1457 = vmatmul.mubr.msk.f32.gmra.mrb[10].mxu1 %vm705_vm1, %v696_v9 }
 0x246   : > { %1459 = vmatprep.mubr.msk.f32.mxu1 %vm705_vm1, %v698_v10  ;;  %v700_v11 = vpop.permute.xlu1 %699 }
 0x248   : > { %v702_v12 = vpop.permute.xlu0 %701 }
 0x249   : > { %1460 = vmatmul.mubr.msk.f32.gmra.mrb[12].mxu1 %vm705_vm1, %v700_v11  ;;  %v943_v11 = vld [vmem:[#allocation2 + $0x8] sm:$0xff] }
 0x24a   : > { %1462 = vmatprep.mubr.msk.f32.mxu1 %vm705_vm1, %v702_v12  ;;  %v704_v13 = vpop.permute.xlu1 %703 }
 0x24d   : > { %1463 = vmatmul.mubr.msk.f32.gmra.mrb[14].mxu1 %vm705_vm1, %v704_v13 }
 0x24e   : > { %1481 = vmatprep.mubr.msk.bf16.mxu1 %vm1328_vm4, %v1974_v33 }
 0x304   : > { %v1443_v35 = vpop.f32.mrb[0].mxu1 }
 0x305   : > { %v888_v36 = vmul.f32 %v1443_v35, %v2273_v24  ;;  %v808_v38 = vpop.f32.mrb[1].mxu1 }
 0x306   : > { %v887_v39 = vmul.f32 %v808_v38, %v2264_v19 }
 0x308   : > { %v903_v41 = vpack.c.bf16 %v888_v36, %v887_v39  ;;  %v1446_v43 = vpop.f32.mrb[2].mxu1 }
 0x309   : > { %v890_v44 = vmul.f32 %v1446_v43, %v2268_v21  ;;  %v818_v46 = vpop.f32.mrb[3].mxu1 }
 0x30a   : > { %v889_v47 = vmul.f32 %v2260_v17, %v818_v46  ;;  %1465 = vmatprep.subr.bf16.mxu1 %v903_v41 }
 0x30b   : > { %1466 = vmatpush3.bf16.msra.mxu1 %v903_v41 }
 0x30c   : > { %v904_v48 = vpack.c.bf16 %v890_v44, %v889_v47  ;;  %v1449_v49 = vpop.f32.mrb[4].mxu1 }
 0x30d   : > { %v892_v50 = vmul.f32 %v1449_v49, %v2296_v45  ;;  %v828_v51 = vpop.f32.mrb[5].mxu1 }
 0x30e   : > { %v891_v52 = vmul.f32 %v828_v51, %v2287_v40  ;;  %1467 = vmatprep.subr.bf16.mxu1 %v904_v48 }
 0x30f   : > { %1468 = vmatpush3.bf16.msra.mxu1 %v904_v48 }
 0x310   : > { %v905_v24 = vpack.c.bf16 %v892_v50, %v891_v52  ;;  %v1452_v19 = vpop.f32.mrb[6].mxu1 }
 0x311   : > { %v894_v53 = vmul.f32 %v1452_v19, %v2291_v42  ;;  %v838_v54 = vpop.f32.mrb[7].mxu1 }
 0x312   : > { %v893_v21 = vmul.f32 %v2283_v37, %v838_v54  ;;  %1469 = vmatprep.subr.bf16.mxu1 %v905_v24 }
 0x313   : > { %1470 = vmatpush3.bf16.msra.mxu1 %v905_v24 }
 0x314   : > { %v906_v17 = vpack.c.bf16 %v894_v53, %v893_v21  ;;  %v1455_v55 = vpop.f32.mrb[8].mxu1 }
 0x315   : > { %v896_v57 = vmul.f32 %v1455_v55, %v2317_v3  ;;  %v848_v58 = vpop.f32.mrb[9].mxu1 }
 0x316   : > { %v895_v45 = vmul.f32 %v848_v58, %v2307_v59  ;;  %1471 = vmatprep.subr.bf16.mxu1 %v906_v17 }
 0x317   : > { %1472 = vmatpush3.bf16.msra.mxu1 %v906_v17 }
 0x318   : > { %v907_v40 = vpack.c.bf16 %v896_v57, %v895_v45  ;;  %v1458_v60 = vpop.f32.mrb[10].mxu1 }
 0x319   : > { %v898_v61 = vmul.f32 %v1458_v60, %v2311_v63  ;;  %v858_v62 = vpop.f32.mrb[11].mxu1 }
 0x31a   : > { %v897_v42 = vmul.f32 %v2303_v56, %v858_v62  ;;  %1473 = vmatprep.subr.bf16.mxu1 %v907_v40 }
 0x31b   : > { %1474 = vmatpush3.bf16.msra.mxu1 %v907_v40 }
 0x31c   : > { %v908_v37 = vpack.c.bf16 %v898_v61, %v897_v42  ;;  %v1461_v0 = vpop.f32.mrb[12].mxu1 }
 0x31d   : > { %v900_v1 = vmul.f32 %v1461_v0, %v2340_v30  ;;  %v868_v2 = vpop.f32.mrb[13].mxu1  ;;  %v944_v30 = vld [vmem:[#allocation2 + $0x10] sm:$0xff] }
 0x31e   : > { %v899_v3 = vmul.f32 %v868_v2, %v2331_v22  ;;  %1475 = vmatprep.subr.bf16.mxu1 %v908_v37 }
 0x31f   : > { %1476 = vmatpush3.bf16.msra.mxu1 %v908_v37 }
 0x320   : > { %v909_v59 = vpack.c.bf16 %v900_v1, %v899_v3  ;;  %v1464_v4 = vpop.f32.mrb[14].mxu1 }
 0x321   : > { %v902_v5 = vmul.f32 %v1464_v4, %v2335_v26  ;;  %v878_v6 = vpop.f32.mrb[15].mxu1 }
 0x322   : > { %v901_v63 = vmul.f32 %v2327_v16, %v878_v6  ;;  %1477 = vmatprep.subr.bf16.mxu1 %v909_v59 }
 0x323   : > { %1478 = vmatpush3.bf16.msra.mxu1 %v909_v59 }
 0x324   : > { %v910_v56 = vpack.c.bf16 %v902_v5, %v901_v63 }
 0x326   : > { %1479 = vmatprep.subr.bf16.mxu1 %v910_v56 }
 0x327   : > { %1480 = vmatpush3.bf16.msra.mxu1 %v910_v56 }
 0x32a   : > { %1482 = vmatmul.mubr.msk.bf16.vlgmr.msra.gmra.mrb[16].mxu1 %vm2381_vm7, %v1974_v33 }
 0x3fd   : > { %v1483_v22 = vpop.f32.mrb[16].mxu1 }
 0x3fe   : > { %v997_v9 = vadd.f32 %v1483_v22, %v944_v30  ;;  %v980_v10 = vpop.f32.mrb[17].mxu1 }
 0x3ff   : > { %v995_v12 = vadd.f32 %v980_v10, %v942_v7  ;;  %v1484_v26 = vpop.f32.mrb[18].mxu1 }
 0x400   : > { %1001 = vst [vmem:[#allocation2 + $0x10] sm:$0xff] %v997_v9  ;;  %v998_v13 = vadd.f32 %v1484_v26, %v945_v8  ;;  %v983_v16 = vpop.f32.mrb[19].mxu1 }
 0x401   : > { %999 = vst [vmem:[#allocation2] sm:$0xff] %v995_v12  ;;  %v996_v14 = vadd.f32 %v983_v16, %v943_v11 }
 0x402   : > { %1002 = vst [vmem:[#allocation2 + $0x18] sm:$0xff] %v998_v13 }
 0x403   : > { %1000 = vst [vmem:[#allocation2 + $0x8] sm:$0xff] %v996_v14 }
 0x404 PF: > { %p1332_p1 = scmp.eq.s32.totalorder %s321_s10, 0 }
 0x405   : > { %v1017_v15 = vld [vmem:[#allocation12] sm:$0xff] (!%p1332_p1)  ;;  %v1018_v18 = vld [vmem:[#allocation12 + $0x8] sm:$0xff] (!%p1332_p1)  ;;  %v1019_v20 = vld [vmem:[#allocation12 + $0x10] sm:$0xff] (!%p1332_p1)  ;;  %v1010_v53 = vlaneseq (!%p1332_p1) }
 0x406   : > { %1005 = sbr.rel (%p1332_p1) target bundleno = 1311 (0x51f), region = 64  ;;  %v1523_v23 = vpack.c.bf16 (!%p1332_p1), %v1018_v18, %v1017_v15  ;;  %v1020_v25 = vld [vmem:[#allocation12 + $0x18] sm:$0xff] (!%p1332_p1)  ;;  %v1021_v28 = vld [vmem:[#allocation12 + $0x20] sm:$0xff] (!%p1332_p1)  ;;  %v1022_v29 = vld [vmem:[#allocation12 + $0x28] sm:$0xff] (!%p1332_p1) }
 0x407   : > { %v1527_v27 = vpack.c.bf16 (!%p1332_p1), %v1020_v25, %v1019_v20  ;;  %v1531_v31 = vpack.c.bf16 (!%p1332_p1), %v1022_v29, %v1021_v28  ;;  %v2407_v33 = vld [vmem:[#allocation2 + $0x10] sm:$0xff] (!%p1332_p1)  ;;  %v1024_v35 = vld [vmem:[#allocation12 + $0x38] sm:$0xff] (!%p1332_p1)  ;;  %v1025_v38 = vld [vmem:[#allocation12 + $0x40] sm:$0xff] (!%p1332_p1)  ;;  %v1011_v60 = vand.u32 (!%p1332_p1), 127, %v1010_v53 }
 0x408   : > { %1524 = vmatprep.subr.bf16.mxu0 (!%p1332_p1), %v1523_v23  ;;  %1555 = vmatprep.subr.bf16.mxu1 (!%p1332_p1), %v1523_v23  ;;  %v2405_v32 = vld [vmem:[#allocation2] sm:$0xff] (!%p1332_p1)  ;;  %v1023_v34 = vld [vmem:[#allocation12 + $0x30] sm:$0xff] (!%p1332_p1)  ;;  %v1026_v39 = vld [vmem:[#allocation12 + $0x48] sm:$0xff] (!%p1332_p1) }
 0x409   : > { %1526 = vmatpush3.bf16.msra.mxu0 (!%p1332_p1), %v1523_v23  ;;  %1563 = vmatpush3.bf16.msra.mxu1 (!%p1332_p1), %v1523_v23  ;;  %v1535_v36 = vpack.c.bf16 (!%p1332_p1), %v1024_v35, %v1023_v34  ;;  %v1539_v41 = vpack.c.bf16 (!%p1332_p1), %v1026_v39, %v1025_v38  ;;  %v1027_v43 = vld [vmem:[#allocation12 + $0x50] sm:$0xff] (!%p1332_p1)  ;;  %v1028_v44 = vld [vmem:[#allocation12 + $0x58] sm:$0xff] (!%p1332_p1)  ;;  %v1029_v47 = vld [vmem:[#allocation12 + $0x60] sm:$0xff] (!%p1332_p1)  ;;  %vm1012_vm12 = vcmp.lt.s32.totalorder (!%p1332_p1), %v1011_v60, 32 }
 0x40a   : > { %1528 = vmatprep.subr.bf16.mxu0 (!%p1332_p1), %v1527_v27  ;;  %1556 = vmatprep.subr.bf16.mxu1 (!%p1332_p1), %v1527_v27  ;;  %v1543_v46 = vpack.c.bf16 (!%p1332_p1), %v1028_v44, %v1027_v43  ;;  %v1030_v48 = vld [vmem:[#allocation12 + $0x68] sm:$0xff] (!%p1332_p1)  ;;  %v1031_v50 = vld [vmem:[#allocation12 + $0x70] sm:$0xff] (!%p1332_p1)  ;;  %v1032_v51 = vld [vmem:[#allocation12 + $0x78] sm:$0xff] (!%p1332_p1)  ;;  %v1013_v37 = vsel (!%p1332_p1), %vm1012_vm12, %v2405_v32, 0.0  ;;  %v1015_v1 = vsel (!%p1332_p1), %vm1012_vm12, %v2407_v33, 0.0 }
 0x40b   : > { %1517 = vmatprep.mubr.f32.mxu0 (!%p1332_p1), %v2405_v32  ;;  %1520 = vmatprep.mubr.f32.mxu1 (!%p1332_p1), %v2407_v33  ;;  %v1547_v49 = vpack.c.bf16 (!%p1332_p1), %v1030_v48, %v1029_v47  ;;  %v1551_v52 = vpack.c.bf16 (!%p1332_p1), %v1032_v51, %v1031_v50  ;;  %v1007_v24 = vld [vmem:[#allocation2 + $0x8] sm:$0xff] (!%p1332_p1)  ;;  %v1009_v19 = vld [vmem:[#allocation2 + $0x18] sm:$0xff] (!%p1332_p1) }
 0x40c   : > { %v1014_v61 = vsel (!%p1332_p1), %vm1012_vm12, %v1007_v24, 0.0  ;;  %v1016_v62 = vsel (!%p1332_p1), %vm1012_vm12, %v1009_v19, 0.0 }
 0x40d   : > { %1530 = vmatpush3.bf16.msra.mxu0 %v1527_v27  ;;  %1564 = vmatpush3.bf16.msra.mxu1 %v1527_v27 }
 0x40e   : > { %1532 = vmatprep.subr.bf16.mxu0 %v1531_v31  ;;  %1557 = vmatprep.subr.bf16.mxu1 %v1531_v31 }
 0x411   : > { %1534 = vmatpush3.bf16.msra.mxu0 %v1531_v31  ;;  %1565 = vmatpush3.bf16.msra.mxu1 %v1531_v31 }
 0x412   : > { %1536 = vmatprep.subr.bf16.mxu0 %v1535_v36  ;;  %1558 = vmatprep.subr.bf16.mxu1 %v1535_v36 }
 0x415   : > { %1538 = vmatpush3.bf16.msra.mxu0 %v1535_v36  ;;  %1566 = vmatpush3.bf16.msra.mxu1 %v1535_v36 }
 0x416   : > { %1540 = vmatprep.subr.bf16.mxu0 %v1539_v41  ;;  %1559 = vmatprep.subr.bf16.mxu1 %v1539_v41 }
 0x419   : > { %1542 = vmatpush3.bf16.msra.mxu0 %v1539_v41  ;;  %1567 = vmatpush3.bf16.msra.mxu1 %v1539_v41 }
 0x41a   : > { %1544 = vmatprep.subr.bf16.mxu0 %v1543_v46  ;;  %1560 = vmatprep.subr.bf16.mxu1 %v1543_v46 }
 0x41d   : > { %1546 = vmatpush3.bf16.msra.mxu0 %v1543_v46  ;;  %1568 = vmatpush3.bf16.msra.mxu1 %v1543_v46 }
 0x41e   : > { %1548 = vmatprep.subr.bf16.mxu0 %v1547_v49  ;;  %1561 = vmatprep.subr.bf16.mxu1 %v1547_v49 }
 0x421   : > { %1550 = vmatpush3.bf16.msra.mxu0 %v1547_v49  ;;  %1569 = vmatpush3.bf16.msra.mxu1 %v1547_v49 }
 0x422   : > { %1552 = vmatprep.subr.bf16.mxu0 %v1551_v52  ;;  %1562 = vmatprep.subr.bf16.mxu1 %v1551_v52 }
 0x425   : > { %1554 = vmatpush3.bf16.msra.mxu0 %v1551_v52  ;;  %1570 = vmatpush3.bf16.msra.mxu1 %v1551_v52 }
 0x428   : > { %1518 = vmatmul.mubr.f32.vlgmr.msra.gmra.mrb[0].mxu0 %v1007_v24  ;;  %1521 = vmatmul.mubr.f32.vlgmr.msra.gmra.mrb[0].mxu1 %v1009_v19 }
 0x4fb   : > { %v1519_v54 = vpop.f32.mrb[0].mxu0  ;;  %v1522_v21 = vpop.f32.mrb[0].mxu1 }
 0x4fc   : > { %vm1119_vm8 = vcmp.eq.f32.partialorder %v1519_v54, 0.0  ;;  %vm1121_vm9 = vcmp.eq.f32.partialorder %v1522_v21, 0.0  ;;  %v1099_v17 = vpop.f32.mrb[1].mxu0  ;;  %v1109_v55 = vpop.f32.mrb[1].mxu1 }
 0x4fd   : > { %v1123_v57 = vsel %vm1119_vm8, 1e-12, %v1519_v54  ;;  %v1125_v58 = vsel %vm1121_vm9, 1e-12, %v1522_v21  ;;  %vm1118_vm10 = vcmp.eq.f32.partialorder %v1099_v17, 0.0  ;;  %vm1120_vm11 = vcmp.eq.f32.partialorder %v1109_v55, 0.0 }
 0x4fe   : > { %1728 = vrcp.f32 %v1123_v57  ;;  %v1122_v45 = vsel %vm1118_vm10, 1e-12, %v1099_v17  ;;  %v1124_v40 = vsel %vm1120_vm11, 1e-12, %v1109_v55 }
 0x4ff   : > { %1730 = vrcp.f32 %v1125_v58 }
 0x500   : > { %1732 = vrcp.f32 %v1122_v45 }
 0x501   : > { %1734 = vrcp.f32 %v1124_v40 }
 0x508   : > { %v1729_v42 = vpop.eup %1728 }
 0x509   : > { %v1731_v0 = vpop.eup %1730  ;;  %v1131_v2 = vmul.f32 %v1729_v42, %v1014_v61 }
 0x50a   : > { %v1733_v3 = vpop.eup %1732  ;;  %v1133_v59 = vmul.f32 %v1731_v0, %v1016_v62 }
 0x50b   : > { %v1735_v4 = vpop.eup %1734  ;;  %v1140_v5 = vmul.f32 1.442695, %v1131_v2  ;;  %v1130_v6 = vmul.f32 %v1733_v3, %v1013_v37  ;;  %vm1135_vm13 = vcmp.gt.f32.partialorder %v1131_v2, 0.0 }
 0x50c   : > { %v1144_v63 = vmul.f32 1.442695, %v1133_v59  ;;  %v1132_v56 = vmul.f32 %v1735_v4, %v1015_v1  ;;  %vm1137_vm14 = vcmp.gt.f32.partialorder %v1133_v59, 0.0 }
 0x50d   : > { %1736 = vpow2.f32 %v1140_v5  ;;  %v1138_v30 = vmul.f32 1.442695, %v1130_v6  ;;  %vm1134_vm15 = vcmp.gt.f32.partialorder %v1130_v6, 0.0 }
 0x50e   : > { %1738 = vpow2.f32 %v1144_v63  ;;  %v1142_v7 = vmul.f32 1.442695, %v1132_v56  ;;  %vm1136_vm0 = vcmp.gt.f32.partialorder %v1132_v56, 0.0 }
 0x50f   : > { %1740 = vpow2.f32 %v1138_v30 }
 0x510   : > { %1742 = vpow2.f32 %v1142_v7 }
 0x517   : > { %v1737_v22 = vpop.eup %1736 }
 0x518   : > { %v1739_v8 = vpop.eup %1738  ;;  %v1334_v9 = vadd.f32 -1.0, %v1737_v22 }
 0x519   : > { %v1741_v10 = vpop.eup %1740  ;;  %v1336_v11 = vadd.f32 -1.0, %v1739_v8 }
 0x51a   : > { %v1743_v12 = vpop.eup %1742  ;;  %v1151_v26 = vsel %vm1135_vm13, %v1131_v2, %v1334_v9  ;;  %v1333_v13 = vadd.f32 -1.0, %v1741_v10 }
 0x51b   : > { %1155 = vst [vmem:[%s2250_s18 + $0x8] sm:$0xff] %v1151_v26  ;;  %v1153_v16 = vsel %vm1137_vm14, %v1133_v59, %v1336_v11  ;;  %v1335_v14 = vadd.f32 -1.0, %v1743_v12 }
 0x51c   : > { %1157 = vst [vmem:[%s2250_s18 + $0x18] sm:$0xff] %v1153_v16  ;;  %v1150_v15 = vsel %vm1134_vm15, %v1130_v6, %v1333_v13 }
 0x51d   : > { %1154 = vst [vmem:[%s2250_s18] sm:$0xff] %v1150_v15  ;;  %v1152_v18 = vsel %vm1136_vm0, %v1132_v56, %v1335_v14 }
 0x51e   : > { %1156 = vst [vmem:[%s2250_s18 + $0x10] sm:$0xff] %v1152_v18 }
 0x51f PF: > { %p2516_p7 = scmp.ne.s32.totalorder %s2501_s14, 0  ;;  %s1173_s10 = sshll.u32 %s2250_s18, 4  ;;  %s2423_s10 = int_to_ptr.vmem [resolvable:$true] %s1173_s10 }
 0x520   : > { %s2432_s12 = scalar_lea.sflag [#allocation9], %s305_s17  ;;  %s1864_s21 = scalar_lea.vmem %s2423_s10, 512 }
 0x521   : > { %s1583_s16 = scalar_select %p2516_p7, [#allocation4], [#allocation15] }
 0x522   : > { %s2534_s29 = smov (!%p2516_p7, %s2075_s29), 0  ;;  %p1865_p9 = scmp.ne.s32.totalorder %s2423_s10, %s1864_s21 }
 0x523   : > { %s1166_s19 = sld [smem:[%s1583_s16 + %s2534_s29]]  ;;  %s1975_s29 = smov [#allocation13]  }
 0x524   : > { %p1866_p13 = pnand %p1865_p9, %p2516_p7  ;;  %s1868_s18 = sshll.u32 %s1975_s29, 4  ;;  %s1869_s18 = int_to_ptr.vmem [resolvable:$false] %s1868_s18 }
 0x525   : > { %s1870_s25 = scalar_lea.vmem %s1869_s18, 1024  ;;  %p1871_p6 = scmp.lt.s32.totalorder %s2423_s10, %s1869_s18 }
 0x526   : > { %p1867_p4 = pneg %p1866_p13  ;;  %p1872_p8 = scmp.lt.s32.totalorder %s1870_s25, %s1864_s21 }
 0x528   : > { %p1873_p2 = por %p1872_p8, %p1871_p6 }
 0x529   : > { %s1343_s30 = sshll.u32 %s1166_s19, 9 }
 0x52a   : > { %s2428_s11 = scalar_lea.hbm %s2488_s8, %s1343_s30  ;;  %p1874_p5 = pnand %p1873_p2, %p1867_p4 }
 0x52c   : > { %1877 = shalt.err (!%p1874_p5)
}
 0x52d   : > { %s1878_s17 = scalar_lea.hbm %s2428_s11, 512  ;;  %s1882_s13 = scalar_lea.hbm %s2488_s8, 1024 }
 0x52e   : > { %p1879_p11 = scmp.ne.s32.totalorder %s2428_s11, %s1878_s17  ;;  %p1883_p3 = scmp.lt.u32.totalorder %s2428_s11, %s2488_s8 }
 0x52f   : > { %p1884_p0 = scmp.lt.u32.totalorder %s1882_s13, %s1878_s17  ;;  %p1886_p9 = scmp.lt.u32.totalorder %s1878_s17, %s2428_s11 }
 0x530   : > { %p1880_p10 = pnand %p1879_p11, %p2516_p7 }
 0x531   : > { %p1885_p1 = por %p1884_p0, %p1883_p3 }
 0x532   : > { %p1881_p12 = pneg %p1880_p10 }
 0x533   : > { %p1887_p13 = por %p1886_p9, %p1885_p1 }
 0x535   : > { %p1888_p4 = pnand %p1887_p13, %p1881_p12 }
 0x537   : > { %1891 = shalt.err (!%p1888_p4)
}
 0x538   : > { %s1976_s19 = smov 128   ;;  %s1977_s30 = smov 8  }
 0x539   : > { %1585 = dma.vmem_to_hbm [thread:$0]  (%p2516_p7), %s2423_s10, 512, %s2428_s11, %s2432_s12, %s1976_s19, %s1976_s19, %s1977_s30  }
 0x53a PF: > { %s2517_s0 = sld [smem:[#allocation22_spill]]  ;;  %p1609_p6 = scmp.ge.s32.totalorder %s1960_s28, 2 }
 0x53b   : > { %s1188_s1 = sand.u32 1, %s1936_s2  }
 0x53c   : > { %s1189_s21 = scalar_lea.sflag [#allocation9], %s1188_s1 }
 0x540   : > { %p2518_p8 = scmp.ne.s32.totalorder %s2517_s0, 0 }
 0x542   : > { %p1601_p2 = pnand %p1609_p6, %p2518_p8 }
 0x544   : > { %1931 = dma.done.wait (!%p1601_p2), %s1189_s21, 512  }
 0x545   : > { %1933 = vsyncadd (!%p1601_p2), %s1189_s21, 4294966784  ;;  %s2519_s29 = sld [smem:[#allocation21_spill]]  ;;  %s2520_s24 = sld [smem:[#allocation23_spill]] }
 0x546   : > { %p34_p7 = scmp.ge.s32.totalorder %s2079_s9, 6   ;;  %s2521_s2 = smov %s1940_s23 }
 0x547   : > { %s2523_s25 = smov %s1952_s26  ;;  %s2524_s26 = smov %s1956_s27 }
 0x548   : > { %s2525_s27 = smov %s2180_s15  ;;  %s2526_s28 = smov %s2079_s9 }
 0x549   :  { %36 = sbr.rel (!%p34_p7) target bundleno = 41 (0x29), region = 108 }
 0x54b   : > { %s2522_s23 = smov %s2519_s29 }
 0x550   :  { %1194 = vsyncpa [#allocation8], 1 }
 0x551   :  { %1196 = vsyncpa [#allocation8 + $0x1], 1 }
 0x552   :  { %1197 = vsyncpa [#allocation11], 1 }
 0x553   :  { %1198 = vsyncpa [#allocation9], 1 }
 0x554   :  { %1200 = vsyncpa [#allocation9 + $0x1], 1 }

</bundles_post_ra>
